<compile_context>
chip_gen: v7x
topology: tpu7x:2x2x1
jax: 0.10.0
libtpu: 0.0.40
codegen_flags: <defaults>
</compile_context>

<pallas_src>
import functools

import jax
import jax.numpy as jnp
from jax.experimental import pallas as pl
from jax.experimental.pallas import tpu as pltpu


def _round_up(x, m):
    return (x + m - 1) // m * m


# -----------------------------------------------------------------------------
# Fused kernel: one (batch, time-tile) grid step
#   patches (tile_t, 128) bf16 @ w1 (128, C) bf16 -> +b1 -> GELU (-> mask pad)
#   -> (bf16) @ w2 (C, D) bf16 -> masked row-sum into per-batch f32 acc.
#   Last time tile: mean over T_frames (+ b2, folded), VPU dot with w_out,
#   + b_out, broadcast the scalar score into a lane-dense (1, 1, 128) block.
# TODO(synk): the real wav2vec 2.0 checkpoint (7-layer conv stack + 12-layer
#             transformer) is not reproduced; the feature extractor is a
#             deterministic synthetic stand-in.
# -----------------------------------------------------------------------------
def fused_kernel(patches_ref, w1_ref, b1_ref, w2_ref, b2_ref,
                 w_out_ref, b_out_ref, out_ref, acc_ref,
                 *, tile_t, t_frames, t_total):
    t = pl.program_id(1)

    @pl.when(t == 0)
    def _():
        acc_ref[...] = jnp.zeros_like(acc_ref)

    p = patches_ref[0]                                       # (tile_t, 128) bf16
    h = jnp.dot(p, w1_ref[...], preferred_element_type=jnp.float32)
    h = jax.nn.gelu(h + b1_ref[...])                         # (tile_t, C) f32

    if t_total != t_frames:  # static: time padding exists -> zero padded rows
        row = t * tile_t + jax.lax.broadcasted_iota(jnp.int32, (tile_t, 1), 0)
        h = jnp.where(row < t_frames, h, 0.0)

    y = jnp.dot(h.astype(jnp.bfloat16), w2_ref[...],
                preferred_element_type=jnp.float32)          # (tile_t, D) f32
    acc_ref[...] += jnp.sum(y, axis=0, keepdims=True)        # (1, D)

    @pl.when(t == pl.num_programs(1) - 1)
    def _():
        # mean over time; b2 added once here instead of per frame (exact fold)
        m = acc_ref[...] * (1.0 / t_frames) + b2_ref[...]    # (1, D) f32
        score = jnp.sum(m * w_out_ref[...]) + b_out_ref[0, 0]  # VPU dot, not MXU
        out_ref[...] = jnp.full(out_ref.shape, score, out_ref.dtype)


def wav2vec_mos_fused(patches, w1, b1, w2, b2, w_out, b_out, *,
                      t_frames, tile_t):
    b, t_total, k_pad = patches.shape
    c = w1.shape[1]
    d = w2.shape[1]
    t_tiles = t_total // tile_t

    kernel = functools.partial(fused_kernel, tile_t=tile_t,
                               t_frames=t_frames, t_total=t_total)

    cost = pl.CostEstimate(
        flops=2 * b * t_total * (k_pad * c + c * d),
        transcendentals=b * t_total * c,
        bytes_accessed=(patches.size * patches.dtype.itemsize
                        + (w1.size + w2.size) * 2
                        + (b1.size + b2.size + w_out.size + b_out.size) * 4
                        + b * 128 * 4),
    )

    out = pl.pallas_call(
        kernel,
        out_shape=jax.ShapeDtypeStruct((b, 1, 128), jnp.float32),
        grid=(b, t_tiles),
        in_specs=[
            pl.BlockSpec((1, tile_t, k_pad), lambda i, j: (i, j, 0)),  # patches
            pl.BlockSpec((k_pad, c), lambda i, j: (0, 0)),             # w1 bf16
            pl.BlockSpec((1, c), lambda i, j: (0, 0)),                 # b1 f32
            pl.BlockSpec((c, d), lambda i, j: (0, 0)),                 # w2 bf16
            pl.BlockSpec((1, d), lambda i, j: (0, 0)),                 # b2 f32
            pl.BlockSpec((1, d), lambda i, j: (0, 0)),                 # w_out f32
            pl.BlockSpec((1, 128), lambda i, j: (0, 0)),               # b_out f32
        ],
        out_specs=pl.BlockSpec((1, 1, 128), lambda i, j: (i, 0, 0)),
        scratch_shapes=[pltpu.VMEM((1, d), jnp.float32)],
        compiler_params=pltpu.CompilerParams(
            dimension_semantics=("parallel", "arbitrary"),
            vmem_limit_bytes=32 * 1024 * 1024),
        cost_estimate=cost,
    )(patches, w1, b1, w2, b2, w_out, b_out)
    return out[:, 0, 0]                                      # (B,)


# -----------------------------------------------------------------------------
# Full forward (glue in plain JAX: squeeze, im2col gather, padding, dtype cast)
# -----------------------------------------------------------------------------
@functools.partial(jax.jit, static_argnames=("kernel_size", "stride"))
def wav2vec_mos_forward(wav, params, *, kernel_size=10, stride=5):
    # wav: (B, 1, T_wav)  ->  squeeze(1)  ->  (B, T_wav)
    wav = jnp.squeeze(wav, axis=1)
    b, t_wav = wav.shape
    t_frames = (t_wav - kernel_size) // stride + 1

    # im2col: (B, T_frames, K) windows of the 1-channel waveform.
    idx = (jnp.arange(t_frames)[:, None] * stride
           + jnp.arange(kernel_size)[None, :])
    patches = wav[:, idx]                                    # (B, T_frames, K) f32

    # Lane-dense padding: K -> 128; T -> multiple of the time tile.
    k_pad = 128
    tile_t = min(256, _round_up(t_frames, 8))
    t_total = _round_up(t_frames, tile_t)
    patches = jnp.pad(patches, ((0, 0), (0, t_total - t_frames),
                                (0, k_pad - kernel_size)))
    patches = patches.astype(jnp.bfloat16)

    # Weights: pad K rows of w1 with zeros, cast matmul operands to bf16 once
    # (accumulation stays f32 in-kernel via preferred_element_type).
    w1 = jnp.pad(params["w1"],
                 ((0, k_pad - kernel_size), (0, 0))).astype(jnp.bfloat16)
    w2 = params["w2"].astype(jnp.bfloat16)
    w_out = params["w_out"].reshape(1, -1)                   # (1, D)
    b_out = jnp.pad(params["b_out"], ((0, 0), (0, 127)))     # (1, 128)

    return wav2vec_mos_fused(patches, w1, params["b1"], w2, params["b2"],
                             w_out, b_out, t_frames=t_frames, tile_t=tile_t)


def init_params(key, *, kernel_size=10, conv_dim=512, wav2vec_out_dim=768):
    k1, k2, k3 = jax.random.split(key, 3)
    scale1 = 1.0 / jnp.sqrt(kernel_size)
    scale2 = 1.0 / jnp.sqrt(conv_dim)
    scale3 = 1.0 / jnp.sqrt(wav2vec_out_dim)
    return {
        # stand-in conv1d (C_in=1) expressed as (K, C_out) matmul weight
        "w1": scale1 * jax.random.normal(k1, (kernel_size, conv_dim), jnp.float32),
        "b1": jnp.zeros((1, conv_dim), jnp.float32),
        # projection to wav2vec feature dim
        "w2": scale2 * jax.random.normal(k2, (conv_dim, wav2vec_out_dim), jnp.float32),
        "b2": jnp.zeros((1, wav2vec_out_dim), jnp.float32),
        # self.output_layer = nn.Linear(wav2vec_out_dim, 1)
        "w_out": scale3 * jax.random.normal(k3, (wav2vec_out_dim, 1), jnp.float32),
        "b_out": jnp.zeros((1, 1), jnp.float32),
    }


if __name__ == "__main__":
    key = jax.random.PRNGKey(0)
    k_wav, k_params = jax.random.split(key)

    B = 2
    KERNEL, STRIDE = 10, 5
    T_FRAMES = 64
    T_WAV = (T_FRAMES - 1) * STRIDE + KERNEL                 # 325

    wav = jax.random.normal(k_wav, (B, 1, T_WAV), jnp.float32)
    params = init_params(k_params)

    out = wav2vec_mos_forward(wav, params, kernel_size=KERNEL, stride=STRIDE)
    out = jax.block_until_ready(out)
    assert out.shape == (B,), out.shape
    assert bool(jnp.all(jnp.isfinite(out)))
    print("KERNEL_OK")
</pallas_src>

<mosaic_0001>
module attributes {stable_mosaic.version = 11 : i64} {
  func.func @fused_kernel(%arg0: i32, %arg1: i32, %arg2: memref<1x64x128xbf16, #tpu.memory_space<vmem>>, %arg3: memref<128x512xbf16, #tpu.memory_space<vmem>>, %arg4: memref<1x512xf32, #tpu.memory_space<vmem>>, %arg5: memref<512x768xbf16, #tpu.memory_space<vmem>>, %arg6: memref<1x768xf32, #tpu.memory_space<vmem>>, %arg7: memref<1x768xf32, #tpu.memory_space<vmem>>, %arg8: memref<1x128xf32, #tpu.memory_space<vmem>>, %arg9: memref<1x1x128xf32, #tpu.memory_space<vmem>>, %arg10: memref<1x768xf32, #tpu.memory_space<vmem>>) attributes {dimension_semantics = [#tpu.dimension_semantics<parallel>, #tpu.dimension_semantics<arbitrary>], iteration_bounds = array<i64: 2, 1>, scalar_prefetch = 0 : i64, scratch_operands = 1 : i64, tpu.core_type = #tpu.core_type<tc>, window_params = [{transform_indices = @transform_0, window_bounds = array<i64: 1, 64, 128>}, {pipeline_mode = #tpu.pipeline_mode<synchronous>, transform_indices = @transform_1, window_bounds = array<i64: 128, 512>}, {pipeline_mode = #tpu.pipeline_mode<synchronous>, transform_indices = @transform_2, window_bounds = array<i64: 1, 512>}, {pipeline_mode = #tpu.pipeline_mode<synchronous>, transform_indices = @transform_3, window_bounds = array<i64: 512, 768>}, {pipeline_mode = #tpu.pipeline_mode<synchronous>, transform_indices = @transform_4, window_bounds = array<i64: 1, 768>}, {pipeline_mode = #tpu.pipeline_mode<synchronous>, transform_indices = @transform_5, window_bounds = array<i64: 1, 768>}, {pipeline_mode = #tpu.pipeline_mode<synchronous>, transform_indices = @transform_6, window_bounds = array<i64: 1, 128>}, {transform_indices = @transform_7, window_bounds = array<i64: 1, 1, 128>}]} {
    %c0_i32 = arith.constant 0 : i32
    %0 = arith.cmpi eq, %arg1, %c0_i32 : i32
    %1 = arith.extui %0 : i1 to i32
    %c0_i32_0 = arith.constant 0 : i32
    %2 = arith.cmpi ne, %1, %c0_i32_0 : i32
    scf.if %2 {
      %cst_21 = arith.constant 0.000000e+00 : f32
      %34 = vector.broadcast %cst_21 : f32 to vector<1x768xf32>
      %c0_22 = arith.constant 0 : index
      %c0_23 = arith.constant 0 : index
      %35 = vector.load %arg10[%c0_22, %c0_23] : memref<1x768xf32, #tpu.memory_space<vmem>>, vector<1x768xf32>
      tpu.vector_store %arg10[%c0_22, %c0_23], %34 {strides = array<i32>} : memref<1x768xf32, #tpu.memory_space<vmem>>, vector<1x768xf32>,
    } else {
    }
    %c0 = arith.constant 0 : index
    %c0_1 = arith.constant 0 : index
    %c0_2 = arith.constant 0 : index
    %3 = vector.load %arg2[%c0, %c0_1, %c0_2] : memref<1x64x128xbf16, #tpu.memory_space<vmem>>, vector<1x64x128xbf16>
    %4 = vector.shape_cast %3 : vector<1x64x128xbf16> to vector<64x128xbf16>
    %c0_3 = arith.constant 0 : index
    %c0_4 = arith.constant 0 : index
    %5 = vector.load %arg3[%c0_3, %c0_4] : memref<128x512xbf16, #tpu.memory_space<vmem>>, vector<128x512xbf16>
    %cst = arith.constant dense<0.000000e+00> : vector<64x512xf32>
    %6 = tpu.matmul %4, %5, %cst {dimension_numbers = #tpu.dot_dimension_numbers<[1], [0], [0], [1], [0, 0, 1, 1], [], []>} : vector<64x128xbf16>, vector<128x512xbf16>, vector<64x512xf32> -> vector<64x512xf32>
    %c0_5 = arith.constant 0 : index
    %c0_6 = arith.constant 0 : index
    %7 = vector.load %arg4[%c0_5, %c0_6] : memref<1x512xf32, #tpu.memory_space<vmem>>, vector<1x512xf32>
    %8 = vector.broadcast %7 : vector<1x512xf32> to vector<64x512xf32>
    %9 = arith.addf %6, %8 : vector<64x512xf32>
    %10 = arith.mulf %9, %9 : vector<64x512xf32>
    %11 = arith.mulf %9, %10 : vector<64x512xf32>
    %cst_7 = arith.constant 4.471500e-02 : f32
    %12 = vector.broadcast %cst_7 : f32 to vector<64x512xf32>
    %13 = arith.mulf %12, %11 : vector<64x512xf32>
    %14 = arith.addf %9, %13 : vector<64x512xf32>
    %cst_8 = arith.constant 0.797884583 : f32
    %15 = vector.broadcast %cst_8 : f32 to vector<64x512xf32>
    %16 = arith.mulf %15, %14 : vector<64x512xf32>
    %17 = math.tanh %16 : vector<64x512xf32>
    %cst_9 = arith.constant 1.000000e+00 : f32
    %18 = vector.broadcast %cst_9 : f32 to vector<64x512xf32>
    %19 = arith.addf %18, %17 : vector<64x512xf32>
    %cst_10 = arith.constant 5.000000e-01 : f32
    %20 = vector.broadcast %cst_10 : f32 to vector<64x512xf32>
    %21 = arith.mulf %20, %19 : vector<64x512xf32>
    %22 = arith.mulf %9, %21 : vector<64x512xf32>
    %23 = arith.truncf %22 : vector<64x512xf32> to vector<64x512xbf16>
    %c0_11 = arith.constant 0 : index
    %c0_12 = arith.constant 0 : index
    %24 = vector.load %arg5[%c0_11, %c0_12] : memref<512x768xbf16, #tpu.memory_space<vmem>>, vector<512x768xbf16>
    %cst_13 = arith.constant dense<0.000000e+00> : vector<64x768xf32>
    %25 = tpu.matmul %23, %24, %cst_13 {dimension_numbers = #tpu.dot_dimension_numbers<[1], [0], [0], [1], [0, 0, 1, 1], [], []>} : vector<64x512xbf16>, vector<512x768xbf16>, vector<64x768xf32> -> vector<64x768xf32>
    %c0_14 = arith.constant 0 : index
    %c0_15 = arith.constant 0 : index
    %26 = vector.load %arg10[%c0_14, %c0_15] : memref<1x768xf32, #tpu.memory_space<vmem>>, vector<1x768xf32>
    %cst_16 = arith.constant dense<0.000000e+00> : vector<768xf32>
    %27 = vector.multi_reduction <add>, %25, %cst_16 [0] : vector<64x768xf32> to vector<768xf32>
    %28 = vector.shape_cast %27 : vector<768xf32> to vector<1x768xf32>
    %29 = arith.addf %26, %28 : vector<1x768xf32>
    %c0_17 = arith.constant 0 : index
    %c0_18 = arith.constant 0 : index
    %30 = vector.load %arg10[%c0_17, %c0_18] : memref<1x768xf32, #tpu.memory_space<vmem>>, vector<1x768xf32>
    tpu.vector_store %arg10[%c0_17, %c0_18], %29 {strides = array<i32>} : memref<1x768xf32, #tpu.memory_space<vmem>>, vector<1x768xf32>,
    %c0_i32_19 = arith.constant 0 : i32
    %31 = arith.cmpi eq, %arg1, %c0_i32_19 : i32
    %32 = arith.extui %31 : i1 to i32
    %c0_i32_20 = arith.constant 0 : i32
    %33 = arith.cmpi ne, %32, %c0_i32_20 : i32
    scf.if %33 {
      %c0_21 = arith.constant 0 : index
      %c0_22 = arith.constant 0 : index
      %34 = vector.load %arg10[%c0_21, %c0_22] : memref<1x768xf32, #tpu.memory_space<vmem>>, vector<1x768xf32>
      %cst_23 = arith.constant 1.562500e-02 : f32
      %35 = vector.broadcast %cst_23 : f32 to vector<1x768xf32>
      %36 = arith.mulf %34, %35 : vector<1x768xf32>
      %c0_24 = arith.constant 0 : index
      %c0_25 = arith.constant 0 : index
      %37 = vector.load %arg6[%c0_24, %c0_25] : memref<1x768xf32, #tpu.memory_space<vmem>>, vector<1x768xf32>
      %38 = arith.addf %36, %37 : vector<1x768xf32>
      %c0_26 = arith.constant 0 : index
      %c0_27 = arith.constant 0 : index
      %39 = vector.load %arg7[%c0_26, %c0_27] : memref<1x768xf32, #tpu.memory_space<vmem>>, vector<1x768xf32>
      %40 = arith.mulf %38, %39 : vector<1x768xf32>
      %41 = vector.shape_cast %40 : vector<1x768xf32> to vector<1x1x768xf32>
      %cst_28 = arith.constant dense<0.000000e+00> : vector<1xf32>
      %42 = vector.multi_reduction <add>, %41, %cst_28 [1, 2] : vector<1x1x768xf32> to vector<1xf32>
      %43 = vector.shape_cast %42 : vector<1xf32> to vector<1x1x1xf32>
      %44 = vector.extract %43[0, 0, 0] : f32 from vector<1x1x1xf32>
      %c0_29 = arith.constant 0 : index
      %c0_30 = arith.constant 0 : index
      %45 = vector.load %arg8[%c0_29, %c0_30] : memref<1x128xf32, #tpu.memory_space<vmem>>, vector<1x1xf32>
      %46 = vector.extract %45[0, 0] : f32 from vector<1x1xf32>
      %47 = arith.addf %44, %46 : f32
      %48 = vector.broadcast %47 : f32 to vector<1x1x128xf32>
      %c0_31 = arith.constant 0 : index
      %c0_32 = arith.constant 0 : index
      %c0_33 = arith.constant 0 : index
      %49 = vector.load %arg9[%c0_31, %c0_32, %c0_33] : memref<1x1x128xf32, #tpu.memory_space<vmem>>, vector<1x1x128xf32>
      tpu.vector_store %arg9[%c0_31, %c0_32, %c0_33], %48 {strides = array<i32>} : memref<1x1x128xf32, #tpu.memory_space<vmem>>, vector<1x1x128xf32>,
    } else {
    }
    return
  }
  func.func @transform_0(%arg0: i32, %arg1: i32) -> (i32, i32, i32) {
    %c0_i32 = arith.constant 0 : i32
    %c0_i32_0 = arith.constant 0 : i32
    return %arg0, %arg1, %c0_i32 : i32, i32, i32
  }
  func.func @transform_1(%arg0: i32, %arg1: i32) -> (i32, i32) {
    %c0_i32 = arith.constant 0 : i32
    %c0_i32_0 = arith.constant 0 : i32
    %c0_i32_1 = arith.constant 0 : i32
    return %c0_i32, %c0_i32_0 : i32, i32
  }
  func.func @transform_2(%arg0: i32, %arg1: i32) -> (i32, i32) {
    %c0_i32 = arith.constant 0 : i32
    %c0_i32_0 = arith.constant 0 : i32
    %c0_i32_1 = arith.constant 0 : i32
    return %c0_i32, %c0_i32_0 : i32, i32
  }
  func.func @transform_3(%arg0: i32, %arg1: i32) -> (i32, i32) {
    %c0_i32 = arith.constant 0 : i32
    %c0_i32_0 = arith.constant 0 : i32
    %c0_i32_1 = arith.constant 0 : i32
    return %c0_i32, %c0_i32_0 : i32, i32
  }
  func.func @transform_4(%arg0: i32, %arg1: i32) -> (i32, i32) {
    %c0_i32 = arith.constant 0 : i32
    %c0_i32_0 = arith.constant 0 : i32
    %c0_i32_1 = arith.constant 0 : i32
    return %c0_i32, %c0_i32_0 : i32, i32
  }
  func.func @transform_5(%arg0: i32, %arg1: i32) -> (i32, i32) {
    %c0_i32 = arith.constant 0 : i32
    %c0_i32_0 = arith.constant 0 : i32
    %c0_i32_1 = arith.constant 0 : i32
    return %c0_i32, %c0_i32_0 : i32, i32
  }
  func.func @transform_6(%arg0: i32, %arg1: i32) -> (i32, i32) {
    %c0_i32 = arith.constant 0 : i32
    %c0_i32_0 = arith.constant 0 : i32
    %c0_i32_1 = arith.constant 0 : i32
    return %c0_i32, %c0_i32_0 : i32, i32
  }
  func.func @transform_7(%arg0: i32, %arg1: i32) -> (i32, i32, i32) {
    %c0_i32 = arith.constant 0 : i32
    %c0_i32_0 = arith.constant 0 : i32
    %c0_i32_1 = arith.constant 0 : i32
    return %arg0, %c0_i32, %c0_i32_0 : i32, i32, i32
  }
}

</mosaic_0001>

<bundles_post_ra>
// kernel: wav2vec_mos_forward.1
= control target key start
LH: loop header
LB: loop body
LE: loop exit
PB: predicated region body
PF: predicated region fallthrough
CT: control target
= control target key end

     0   :  { %s3646_s24 = smov 0   ;;  %s3648_s25 = smov 0   ;;  %s4905_s0 = inlined_call_operand.vmem [shape: bf16[2,64,128], index: 0, kind: input, shape index: {}]   ;;  %s4906_s1 = inlined_call_operand.vmem [shape: bf16[128,512], index: 1, kind: input, shape index: {}]   ;;  %s4907_s2 = inlined_call_operand.vmem [shape: f32[1,512], index: 2, kind: input, shape index: {}]   ;;  %s4908_s3 = inlined_call_operand.vmem [shape: bf16[512,768], index: 3, kind: input, shape index: {}]   ;;  %s4909_s4 = inlined_call_operand.vmem [shape: f32[1,768], index: 4, kind: input, shape index: {}]   ;;  %s4910_s5 = inlined_call_operand.vmem [shape: f32[1,768], index: 5, kind: input, shape index: {}]   ;;  %s4911_s6 = inlined_call_operand.vmem [shape: f32[1,128], index: 6, kind: input, shape index: {}]   ;;  %s4912_s7 = inlined_call_operand.vmem [shape: f32[2,1,128], index: 7, kind: output, shape index: {}]  }
   0x1   :  { %s3650_s26 = smov 0  }
   0x2 LB: > { %s29_s27 = sadd.s32 1, %s3597_s25  ;;  %p2862_p0 = scmp.ge.s32.totalorder %s3601_s26, 1  ;;  %s3601_s26 = sphi %s3650_s26, %s17_s26   ;;  %s3597_s25 = sphi %s3648_s25, %s4933_s25   ;;  %s3593_s24 = sphi %s3646_s24, %s4932_s24  }
   0x3   : > { %p31_p1 = scmp.ge.s32.totalorder %s29_s27, 2  ;;  %p256_p2 = scmp.lt.s32.totalorder %s3601_s26, 3 }
   0x5   : > { %s4935_s27 = smov (%p31_p1, %s29_s27), 0  ;;  %p257_p3 = pnand %p2862_p0, %p256_p2 }
   0x7   : > { %260 = sbr.rel (%p257_p3) target bundleno = 956 (0x3bc), region = 48 }
   0xe   : > { %v3175_v0 = vld [vmem:[%s4906_s1 + $0x4] ss:$16 sps:$4 sm:$0xff]   ;;  %v3177_v1 = vld [vmem:[%s4906_s1 + $0xc] ss:$16 sps:$4 sm:$0xff]   ;;  %v3603_v2 = vmov 0   ;;  %p291_p4 = scmp.lt.s32.totalorder %s3593_s24, 1 }
   0xf   : > { %591 = vmatprep.mubr.bf16.mxu0 %v3603_v2  ;;  %664 = vmatprep.mubr.bf16.mxu1 %v3603_v2  ;;  %v3179_v3 = vld [vmem:[%s4906_s1] ss:$16 sps:$4 sm:$0xff]   ;;  %v3180_v4 = vld [vmem:[%s4906_s1 + $0x8] ss:$16 sps:$4 sm:$0xff]   ;;  %v3181_v5 = vld [vmem:[%s4906_s1 + $0x24] ss:$16 sps:$4 sm:$0xff]  }
  0x10   : > { %559 = vmatprep.subr.bf16.mxu0 %v3175_v0  ;;  %632 = vmatprep.subr.bf16.mxu1 %v3177_v1  ;;  %v3183_v6 = vld [vmem:[%s4906_s1 + $0x2c] ss:$16 sps:$4 sm:$0xff]   ;;  %v3185_v7 = vld [vmem:[%s4906_s1 + $0x20] ss:$16 sps:$4 sm:$0xff]   ;;  %v3186_v8 = vld [vmem:[%s4906_s1 + $0x28] ss:$16 sps:$4 sm:$0xff]  }
  0x11   : > { %560 = vmatpush1.bf16.msra.mxu0 %v3179_v3  ;;  %633 = vmatpush1.bf16.msra.mxu1 %v3180_v4  ;;  %v3187_v9 = vld [vmem:[%s4906_s1 + $0x44] ss:$16 sps:$4 sm:$0xff]   ;;  %v3189_v10 = vld [vmem:[%s4906_s1 + $0x4c] ss:$16 sps:$4 sm:$0xff]   ;;  %v3191_v11 = vld [vmem:[%s4906_s1 + $0x40] ss:$16 sps:$4 sm:$0xff]  }
  0x12   : > { %561 = vmatprep.subr.bf16.mxu0 %v3181_v5  ;;  %634 = vmatprep.subr.bf16.mxu1 %v3183_v6  ;;  %v3192_v12 = vld [vmem:[%s4906_s1 + $0x48] ss:$16 sps:$4 sm:$0xff]   ;;  %v3193_v13 = vld [vmem:[%s4906_s1 + $0x64] ss:$16 sps:$4 sm:$0xff]   ;;  %v3195_v14 = vld [vmem:[%s4906_s1 + $0x6c] ss:$16 sps:$4 sm:$0xff]  }
  0x13   : > { %v3197_v15 = vld [vmem:[%s4906_s1 + $0x60] ss:$16 sps:$4 sm:$0xff]   ;;  %v3198_v16 = vld [vmem:[%s4906_s1 + $0x68] ss:$16 sps:$4 sm:$0xff]   ;;  %v3199_v17 = vld [vmem:[%s4906_s1 + $0x84] ss:$16 sps:$4 sm:$0xff]  }
  0x14   : > { %v3201_v18 = vld [vmem:[%s4906_s1 + $0x8c] ss:$16 sps:$4 sm:$0xff]   ;;  %s4937_s24 = smov (!%p291_p4, %s3593_s24), 1  ;;  %v3203_v19 = vld [vmem:[%s4906_s1 + $0x80] ss:$16 sps:$4 sm:$0xff]   ;;  %vm2771_vm1 = vcmask 1040384  }
  0x15   : > { %562 = vmatpush1.bf16.msra.mxu0 %v3185_v7  ;;  %635 = vmatpush1.bf16.msra.mxu1 %v3186_v8  ;;  %v3204_v20 = vld [vmem:[%s4906_s1 + $0x88] ss:$16 sps:$4 sm:$0xff]   ;;  %v3205_v21 = vld [vmem:[%s4906_s1 + $0xa4] ss:$16 sps:$4 sm:$0xff]   ;;  %v3207_v22 = vld [vmem:[%s4906_s1 + $0xac] ss:$16 sps:$4 sm:$0xff]   ;;  %s302_s16 = scalar_lea.vmem %s4912_s7, %s4937_s24 }
  0x16   : > { %563 = vmatprep.subr.bf16.mxu0 %v3187_v9  ;;  %636 = vmatprep.subr.bf16.mxu1 %v3189_v10  ;;  %s3095_s11 = sshll.u32 %s4937_s24, 5  ;;  %v3209_v23 = vld [vmem:[%s4906_s1 + $0xa0] ss:$16 sps:$4 sm:$0xff]   ;;  %v3210_v24 = vld [vmem:[%s4906_s1 + $0xa8] ss:$16 sps:$4 sm:$0xff]  }
  0x17   : > { %v3211_v25 = vld [vmem:[%s4906_s1 + $0xc4] ss:$16 sps:$4 sm:$0xff]   ;;  %s3751_s20 = scalar_lea.vmem %s4905_s0, %s3095_s11  ;;  %v3213_v26 = vld [vmem:[%s4906_s1 + $0xcc] ss:$16 sps:$4 sm:$0xff]   ;;  %v3215_v27 = vld [vmem:[%s4906_s1 + $0xc0] ss:$16 sps:$4 sm:$0xff]  }
  0x18   : > { %v3216_v28 = vld [vmem:[%s4906_s1 + $0xc8] ss:$16 sps:$4 sm:$0xff]   ;;  %v3217_v29 = vld [vmem:[%s4906_s1 + $0xe4] ss:$16 sps:$4 sm:$0xff]   ;;  %v3219_v30 = vld [vmem:[%s4906_s1 + $0xec] ss:$16 sps:$4 sm:$0xff]  }
  0x19   : > { %564 = vmatpush1.bf16.msra.mxu0 %v3191_v11  ;;  %637 = vmatpush1.bf16.msra.mxu1 %v3192_v12  ;;  %v3221_v31 = vld [vmem:[%s4906_s1 + $0xe0] ss:$16 sps:$4 sm:$0xff]   ;;  %v3222_v32 = vld [vmem:[%s4906_s1 + $0xe8] ss:$16 sps:$4 sm:$0xff]   ;;  %v3229_v33 = vld [vmem:[%s4908_s3 + $0x4] ss:$24 sps:$4 sm:$0xff]  }
  0x1a   : > { %565 = vmatprep.subr.bf16.mxu0 %v3193_v13  ;;  %638 = vmatprep.subr.bf16.mxu1 %v3195_v14  ;;  %v3232_v34 = vld [vmem:[%s4908_s3 + $0x304] ss:$24 sps:$4 sm:$0xff]   ;;  %v3227_v36 = vld [vmem:[%s4908_s3] ss:$24 sps:$4 sm:$0xff]   ;;  %v3235_v38 = vld [vmem:[%s4908_s3 + $0x34] ss:$24 sps:$4 sm:$0xff]  }
  0x1b   : > { %v3223_v35 = vld [vmem:[%s3751_s20] sm:$0xff]   ;;  %v3238_v39 = vld [vmem:[%s4908_s3 + $0x334] ss:$24 sps:$4 sm:$0xff]   ;;  %v3233_v40 = vld [vmem:[%s4908_s3 + $0x30] ss:$24 sps:$4 sm:$0xff]  }
  0x1c   : > { %v3230_v37 = vld [vmem:[%s4908_s3 + $0x300] ss:$24 sps:$4 sm:$0xff]   ;;  %v3236_v41 = vld [vmem:[%s4908_s3 + $0x330] ss:$24 sps:$4 sm:$0xff]   ;;  %v3241_v42 = vld [vmem:[%s4908_s3 + $0x64] ss:$24 sps:$4 sm:$0xff]  }
  0x1d   : > { %566 = vmatpush1.bf16.msra.mxu0 %v3197_v15  ;;  %639 = vmatpush1.bf16.msra.mxu1 %v3198_v16  ;;  %v3244_v43 = vld [vmem:[%s4908_s3 + $0x364] ss:$24 sps:$4 sm:$0xff]   ;;  %v3224_v44 = vld [vmem:[%s3751_s20 + $0x8] sm:$0xff]   ;;  %v3239_v45 = vld [vmem:[%s4908_s3 + $0x60] ss:$24 sps:$4 sm:$0xff]  }
  0x1e   : > { %567 = vmatprep.subr.bf16.mxu0 %v3199_v17  ;;  %640 = vmatprep.subr.bf16.mxu1 %v3201_v18  ;;  %v3242_v46 = vld [vmem:[%s4908_s3 + $0x360] ss:$24 sps:$4 sm:$0xff]   ;;  %v3247_v47 = vld [vmem:[%s4908_s3 + $0x94] ss:$24 sps:$4 sm:$0xff]   ;;  %v3245_v49 = vld [vmem:[%s4908_s3 + $0x90] ss:$24 sps:$4 sm:$0xff]  }
  0x1f   : > { %v3250_v48 = vld [vmem:[%s4908_s3 + $0x394] ss:$24 sps:$4 sm:$0xff]   ;;  %v3248_v50 = vld [vmem:[%s4908_s3 + $0x390] ss:$24 sps:$4 sm:$0xff]   ;;  %v3253_v52 = vld [vmem:[%s4908_s3 + $0xc4] ss:$24 sps:$4 sm:$0xff]  }
  0x20   : > { %v3225_v51 = vld [vmem:[%s3751_s20 + $0x10] sm:$0xff]   ;;  %v3256_v53 = vld [vmem:[%s4908_s3 + $0x3c4] ss:$24 sps:$4 sm:$0xff]   ;;  %v3251_v54 = vld [vmem:[%s4908_s3 + $0xc0] ss:$24 sps:$4 sm:$0xff]  }
  0x21   : > { %568 = vmatpush1.bf16.msra.mxu0 %v3203_v19  ;;  %641 = vmatpush1.bf16.msra.mxu1 %v3204_v20  ;;  %v3254_v55 = vld [vmem:[%s4908_s3 + $0x3c0] ss:$24 sps:$4 sm:$0xff]   ;;  %v3259_v56 = vld [vmem:[%s4908_s3 + $0xf4] ss:$24 sps:$4 sm:$0xff]   ;;  %v3257_v58 = vld [vmem:[%s4908_s3 + $0xf0] ss:$24 sps:$4 sm:$0xff]  }
  0x22   : > { %569 = vmatprep.subr.bf16.mxu0 %v3205_v21  ;;  %642 = vmatprep.subr.bf16.mxu1 %v3207_v22  ;;  %v3262_v57 = vld [vmem:[%s4908_s3 + $0x3f4] ss:$24 sps:$4 sm:$0xff]   ;;  %v3260_v59 = vld [vmem:[%s4908_s3 + $0x3f0] ss:$24 sps:$4 sm:$0xff]   ;;  %v3265_v60 = vld [vmem:[%s4908_s3 + $0x124] ss:$24 sps:$4 sm:$0xff]  }
  0x23   : > { %v3268_v61 = vld [vmem:[%s4908_s3 + $0x424] ss:$24 sps:$4 sm:$0xff]   ;;  %v3263_v63 = vld [vmem:[%s4908_s3 + $0x120] ss:$24 sps:$4 sm:$0xff]   ;;  %v3271_v1 = vld [vmem:[%s4908_s3 + $0x154] ss:$24 sps:$4 sm:$0xff]  }
  0x24   : > { %v3226_v62 = vld [vmem:[%s3751_s20 + $0x18] sm:$0xff]   ;;  %v3269_v3 = vld [vmem:[%s4908_s3 + $0x150] ss:$24 sps:$4 sm:$0xff]   ;;  %v3283_v9 = vld [vmem:[%s4908_s3 + $0x1b4] ss:$24 sps:$4 sm:$0xff]  }
  0x25   : > { %570 = vmatpush1.bf16.msra.mxu0 %v3209_v23  ;;  %643 = vmatpush1.bf16.msra.mxu1 %v3210_v24  ;;  %v3266_v0 = vld [vmem:[%s4908_s3 + $0x420] ss:$24 sps:$4 sm:$0xff]   ;;  %v3272_v4 = vld [vmem:[%s4908_s3 + $0x450] ss:$24 sps:$4 sm:$0xff]   ;;  %v3277_v5 = vld [vmem:[%s4908_s3 + $0x184] ss:$24 sps:$4 sm:$0xff]  }
  0x26   : > { %571 = vmatprep.subr.bf16.mxu0 %v3211_v25  ;;  %644 = vmatprep.subr.bf16.mxu1 %v3213_v26  ;;  %v3280_v6 = vld [vmem:[%s4908_s3 + $0x484] ss:$24 sps:$4 sm:$0xff]   ;;  %v3275_v7 = vld [vmem:[%s4908_s3 + $0x180] ss:$24 sps:$4 sm:$0xff]   ;;  %v3286_v10 = vld [vmem:[%s4908_s3 + $0x4b4] ss:$24 sps:$4 sm:$0xff]  }
  0x27   : > { %v3278_v8 = vld [vmem:[%s4908_s3 + $0x480] ss:$24 sps:$4 sm:$0xff]   ;;  %v3281_v11 = vld [vmem:[%s4908_s3 + $0x1b0] ss:$24 sps:$4 sm:$0xff]   ;;  %v3289_v13 = vld [vmem:[%s4908_s3 + $0x1e4] ss:$24 sps:$4 sm:$0xff]  }
  0x28   : > { %v3284_v12 = vld [vmem:[%s4908_s3 + $0x4b0] ss:$24 sps:$4 sm:$0xff]   ;;  %v3292_v14 = vld [vmem:[%s4908_s3 + $0x4e4] ss:$24 sps:$4 sm:$0xff]   ;;  %v3287_v15 = vld [vmem:[%s4908_s3 + $0x1e0] ss:$24 sps:$4 sm:$0xff]  }
  0x29   : > { %572 = vmatpush1.bf16.msra.mxu0 %v3215_v27  ;;  %645 = vmatpush1.bf16.msra.mxu1 %v3216_v28  ;;  %v3290_v16 = vld [vmem:[%s4908_s3 + $0x4e0] ss:$24 sps:$4 sm:$0xff]   ;;  %v3295_v17 = vld [vmem:[%s4908_s3 + $0x214] ss:$24 sps:$4 sm:$0xff]   ;;  %v3293_v19 = vld [vmem:[%s4908_s3 + $0x210] ss:$24 sps:$4 sm:$0xff]  }
  0x2a   : > { %573 = vmatprep.subr.bf16.mxu0 %v3217_v29  ;;  %646 = vmatprep.subr.bf16.mxu1 %v3219_v30  ;;  %v3298_v18 = vld [vmem:[%s4908_s3 + $0x514] ss:$24 sps:$4 sm:$0xff]   ;;  %v3296_v20 = vld [vmem:[%s4908_s3 + $0x510] ss:$24 sps:$4 sm:$0xff]   ;;  %v3301_v21 = vld [vmem:[%s4908_s3 + $0x244] ss:$24 sps:$4 sm:$0xff]  }
  0x2b   : > { %v3304_v22 = vld [vmem:[%s4908_s3 + $0x544] ss:$24 sps:$4 sm:$0xff]   ;;  %v3299_v23 = vld [vmem:[%s4908_s3 + $0x240] ss:$24 sps:$4 sm:$0xff]   ;;  %v3307_v25 = vld [vmem:[%s4908_s3 + $0x274] ss:$24 sps:$4 sm:$0xff]  }
  0x2c   : > { %v3302_v24 = vld [vmem:[%s4908_s3 + $0x540] ss:$24 sps:$4 sm:$0xff]   ;;  %v3310_v26 = vld [vmem:[%s4908_s3 + $0x574] ss:$24 sps:$4 sm:$0xff]   ;;  %v3305_v27 = vld [vmem:[%s4908_s3 + $0x270] ss:$24 sps:$4 sm:$0xff]  }
  0x2d   : > { %574 = vmatpush1.bf16.msra.mxu0 %v3221_v31  ;;  %647 = vmatpush1.bf16.msra.mxu1 %v3222_v32  ;;  %v3308_v28 = vld [vmem:[%s4908_s3 + $0x570] ss:$24 sps:$4 sm:$0xff]   ;;  %v3313_v29 = vld [vmem:[%s4908_s3 + $0x2a4] ss:$24 sps:$4 sm:$0xff]   ;;  %v3311_v31 = vld [vmem:[%s4908_s3 + $0x2a0] ss:$24 sps:$4 sm:$0xff]  }
  0x2e   : > { %2161 = vmatprep.subr.bf16.mxu1 %v3229_v33  ;;  %2234 = vmatprep.subr.bf16.mxu0 %v3232_v34  ;;  %v3316_v30 = vld [vmem:[%s4908_s3 + $0x5a4] ss:$24 sps:$4 sm:$0xff]   ;;  %v3314_v32 = vld [vmem:[%s4908_s3 + $0x5a0] ss:$24 sps:$4 sm:$0xff]   ;;  %v3319_v33 = vld [vmem:[%s4908_s3 + $0x2d4] ss:$24 sps:$4 sm:$0xff]  }
  0x2f   : > { %v3322_v34 = vld [vmem:[%s4908_s3 + $0x5d4] ss:$24 sps:$4 sm:$0xff]  }
  0x30   : > { %592 = vmatmul.mubr.bf16.vlgmr.msra.gmra.mrb[0].mxu0 %v3223_v35  ;;  %665 = vmatmul.mubr.bf16.vlgmr.msra.gmra.mrb[0].mxu1 %v3223_v35  ;;  %v3317_v35 = vld [vmem:[%s4908_s3 + $0x2d0] ss:$24 sps:$4 sm:$0xff]  }
  0x31   : > { %601 = vmatprep.mubr.bf16.mxu0 %v3603_v2  ;;  %674 = vmatprep.mubr.bf16.mxu1 %v3603_v2 }
  0x32   : > { %2162 = vmatpush1.bf16.msra.mxu1 %v3227_v36  ;;  %2235 = vmatpush1.bf16.msra.mxu0 %v3230_v37  ;;  %v3320_v36 = vld [vmem:[%s4908_s3 + $0x5d0] ss:$24 sps:$4 sm:$0xff]   ;;  %v3325_v37 = vld [vmem:[%s4908_s3 + $0xc] ss:$24 sps:$4 sm:$0xff]  }
  0x33   : > { %2163 = vmatprep.subr.bf16.mxu1 %v3235_v38  ;;  %2236 = vmatprep.subr.bf16.mxu0 %v3238_v39  ;;  %v3328_v38 = vld [vmem:[%s4908_s3 + $0x14] ss:$24 sps:$4 sm:$0xff]   ;;  %v4917_v39 = vlaneseq }
  0x36   : > { %2164 = vmatpush1.bf16.msra.mxu1 %v3233_v40  ;;  %2237 = vmatpush1.bf16.msra.mxu0 %v3236_v41  ;;  %v3983_v40 = vshrl.u32 %v4917_v39, 7 }
  0x37   : > { %2165 = vmatprep.subr.bf16.mxu1 %v3241_v42  ;;  %2238 = vmatprep.subr.bf16.mxu0 %v3244_v43  ;;  %v353_v43 = vld [vmem:[%s4907_s2] sm:$0xf] }
  0x38   : > { %602 = vmatmul.mubr.bf16.gmra.mrb[4].mxu0 %v3224_v44  ;;  %675 = vmatmul.mubr.bf16.gmra.mrb[4].mxu1 %v3224_v44  ;;  %4921 = vst [vmem:[#allocation3_spill] sm:$0xff] %v3983_v40  ;;  %v4916_v41 = vsub.s32 0, %v3983_v40  ;;  %v4914_v42 = vsub.s32 2, %v3983_v40  ;;  %v4915_v44 = vsub.s32 1, %v3983_v40 }
  0x39   : > { %611 = vmatprep.mubr.bf16.mxu0 %v3603_v2  ;;  %684 = vmatprep.mubr.bf16.mxu1 %v3603_v2 }
  0x3a   : > { %2166 = vmatpush1.bf16.msra.mxu1 %v3239_v45  ;;  %2239 = vmatpush1.bf16.msra.mxu0 %v3242_v46  ;;  %v4913_v45 = vsub.s32 3, %v3983_v40  ;;  %v3994_v46 = vrot.slane %v353_v43, %v4916_v41 }
  0x3b   : > { %2167 = vmatprep.subr.bf16.mxu1 %v3247_v47  ;;  %2240 = vmatprep.subr.bf16.mxu0 %v3250_v48  ;;  %v3998_v47 = vrot.slane %v353_v43, %v4914_v42  ;;  %v4002_v48 = vrot.slane %v353_v43, %v4915_v44 }
  0x3e   : > { %2168 = vmatpush1.bf16.msra.mxu1 %v3245_v49  ;;  %2241 = vmatpush1.bf16.msra.mxu0 %v3248_v50  ;;  %v4006_v49 = vrot.slane %v353_v43, %v4913_v45 }
  0x3f   : > { %2169 = vmatprep.subr.bf16.mxu1 %v3253_v52  ;;  %2242 = vmatprep.subr.bf16.mxu0 %v3256_v53 }
  0x40   : > { %612 = vmatmul.mubr.bf16.gmra.mrb[8].mxu0 %v3225_v51  ;;  %685 = vmatmul.mubr.bf16.gmra.mrb[8].mxu1 %v3225_v51 }
  0x41   : > { %621 = vmatprep.mubr.bf16.mxu0 %v3603_v2  ;;  %694 = vmatprep.mubr.bf16.mxu1 %v3603_v2  ;;  %v3274_v2 = vld [vmem:[%s4908_s3 + $0x454] ss:$24 sps:$4 sm:$0xff]  }
  0x42   : > { %2170 = vmatpush1.bf16.msra.mxu1 %v3251_v54  ;;  %2243 = vmatpush1.bf16.msra.mxu0 %v3254_v55 }
  0x43   : > { %2171 = vmatprep.subr.bf16.mxu1 %v3259_v56  ;;  %2244 = vmatprep.subr.bf16.mxu0 %v3262_v57 }
  0x46   : > { %2172 = vmatpush1.bf16.msra.mxu1 %v3257_v58  ;;  %2245 = vmatpush1.bf16.msra.mxu0 %v3260_v59 }
  0x47   : > { %2173 = vmatprep.subr.bf16.mxu1 %v3265_v60  ;;  %2246 = vmatprep.subr.bf16.mxu0 %v3268_v61 }
  0x48   : > { %622 = vmatmul.mubr.bf16.gmra.mrb[12].mxu0 %v3226_v62  ;;  %695 = vmatmul.mubr.bf16.gmra.mrb[12].mxu1 %v3226_v62 }
  0x4a   : > { %2174 = vmatpush1.bf16.msra.mxu1 %v3263_v63  ;;  %2247 = vmatpush1.bf16.msra.mxu0 %v3266_v0 }
  0x4b   : > { %2175 = vmatprep.subr.bf16.mxu1 %v3271_v1  ;;  %2248 = vmatprep.subr.bf16.mxu0 %v3274_v2 }
  0x4e   : > { %2176 = vmatpush1.bf16.msra.mxu1 %v3269_v3  ;;  %2249 = vmatpush1.bf16.msra.mxu0 %v3272_v4 }
  0x4f   : > { %2177 = vmatprep.subr.bf16.mxu1 %v3277_v5  ;;  %2250 = vmatprep.subr.bf16.mxu0 %v3280_v6 }
  0x52   : > { %2178 = vmatpush1.bf16.msra.mxu1 %v3275_v7  ;;  %2251 = vmatpush1.bf16.msra.mxu0 %v3278_v8 }
  0x53   : > { %2179 = vmatprep.subr.bf16.mxu1 %v3283_v9  ;;  %2252 = vmatprep.subr.bf16.mxu0 %v3286_v10 }
  0x56   : > { %2180 = vmatpush1.bf16.msra.mxu1 %v3281_v11  ;;  %2253 = vmatpush1.bf16.msra.mxu0 %v3284_v12 }
  0x57   : > { %2181 = vmatprep.subr.bf16.mxu1 %v3289_v13  ;;  %2254 = vmatprep.subr.bf16.mxu0 %v3292_v14 }
  0x5a   : > { %2182 = vmatpush1.bf16.msra.mxu1 %v3287_v15  ;;  %2255 = vmatpush1.bf16.msra.mxu0 %v3290_v16 }
  0x5b   : > { %2183 = vmatprep.subr.bf16.mxu1 %v3295_v17  ;;  %2256 = vmatprep.subr.bf16.mxu0 %v3298_v18 }
  0x5e   : > { %2184 = vmatpush1.bf16.msra.mxu1 %v3293_v19  ;;  %2257 = vmatpush1.bf16.msra.mxu0 %v3296_v20 }
  0x5f   : > { %2185 = vmatprep.subr.bf16.mxu1 %v3301_v21  ;;  %2258 = vmatprep.subr.bf16.mxu0 %v3304_v22 }
  0x62   : > { %2186 = vmatpush1.bf16.msra.mxu1 %v3299_v23  ;;  %2259 = vmatpush1.bf16.msra.mxu0 %v3302_v24 }
  0x63   : > { %2187 = vmatprep.subr.bf16.mxu1 %v3307_v25  ;;  %2260 = vmatprep.subr.bf16.mxu0 %v3310_v26 }
  0x66   : > { %2188 = vmatpush1.bf16.msra.mxu1 %v3305_v27  ;;  %2261 = vmatpush1.bf16.msra.mxu0 %v3308_v28 }
  0x67   : > { %2189 = vmatprep.subr.bf16.mxu1 %v3313_v29  ;;  %2262 = vmatprep.subr.bf16.mxu0 %v3316_v30 }
  0x6a   : > { %2190 = vmatpush1.bf16.msra.mxu1 %v3311_v31  ;;  %2263 = vmatpush1.bf16.msra.mxu0 %v3314_v32 }
  0x6b   : > { %2191 = vmatprep.subr.bf16.mxu1 %v3319_v33  ;;  %2264 = vmatprep.subr.bf16.mxu0 %v3322_v34 }
  0x6e   : > { %2192 = vmatpush1.bf16.msra.mxu1 %v3317_v35  ;;  %2265 = vmatpush1.bf16.msra.mxu0 %v3320_v36 }
  0x6f   : > { %2307 = vmatprep.subr.bf16.mxu1 %v3325_v37  ;;  %2453 = vmatprep.subr.bf16.mxu0 %v3328_v38 }
 0x103   : > { %v593_v50 = vpop.f32.mrb[0].mxu0  ;;  %v666_v51 = vpop.f32.mrb[0].mxu1 }
 0x104   : > { %v4009_v52 = vadd.f32 %v593_v50, %v3994_v46  ;;  %v4012_v53 = vadd.f32 %v666_v51, %v3998_v47  ;;  %v595_v54 = vpop.f32.mrb[1].mxu0  ;;  %v668_v55 = vpop.f32.mrb[1].mxu1 }
 0x105   : > { %v4015_v56 = vadd.f32 %v595_v54, %v4002_v48  ;;  %v4018_v57 = vadd.f32 %v668_v55, %v4006_v49  ;;  %v597_v58 = vpop.f32.mrb[2].mxu0  ;;  %v670_v59 = vpop.f32.mrb[2].mxu1 }
 0x106   : > { %v705_v60 = vmul.f32 %v4009_v52, %v4009_v52  ;;  %v707_v61 = vmul.f32 %v4012_v53, %v4012_v53  ;;  %v4025_v62 = vadd.f32 %v597_v58, %v3994_v46  ;;  %v4028_v63 = vadd.f32 %v670_v59, %v3998_v47  ;;  %v599_v0 = vpop.f32.mrb[3].mxu0  ;;  %v672_v1 = vpop.f32.mrb[3].mxu1 }
 0x107   : > { %v706_v2 = vmul.f32 %v4015_v56, %v4015_v56  ;;  %v708_v3 = vmul.f32 %v4018_v57, %v4018_v57  ;;  %v4035_v4 = vadd.f32 %v599_v0, %v4002_v48  ;;  %v4038_v5 = vadd.f32 %v672_v1, %v4006_v49 }
 0x108   : > { %v737_v6 = vmul.f32 %v705_v60, %v4009_v52  ;;  %v739_v7 = vmul.f32 %v707_v61, %v4012_v53  ;;  %v709_v8 = vmul.f32 %v4025_v62, %v4025_v62  ;;  %v711_v9 = vmul.f32 %v4028_v63, %v4028_v63 }
 0x109   : > { %v738_v10 = vmul.f32 %v706_v2, %v4015_v56  ;;  %v740_v11 = vmul.f32 %v708_v3, %v4018_v57  ;;  %v710_v12 = vmul.f32 %v4035_v4, %v4035_v4  ;;  %v712_v13 = vmul.f32 %v4038_v5, %v4038_v5 }
 0x10a   : > { %v769_v14 = vmul.f32 0.044715, %v737_v6  ;;  %v771_v15 = vmul.f32 0.044715, %v739_v7  ;;  %v741_v16 = vmul.f32 %v709_v8, %v4025_v62  ;;  %v743_v17 = vmul.f32 %v711_v9, %v4028_v63 }
 0x10b   : > { %v770_v18 = vmul.f32 0.044715, %v738_v10  ;;  %v772_v19 = vmul.f32 0.044715, %v740_v11  ;;  %v742_v20 = vmul.f32 %v710_v12, %v4035_v4  ;;  %v744_v21 = vmul.f32 %v712_v13, %v4038_v5  ;;  %v603_v22 = vpop.f32.mrb[4].mxu0  ;;  %v676_v23 = vpop.f32.mrb[4].mxu1 }
 0x10c   : > { %v801_v24 = vadd.f32 %v769_v14, %v4009_v52  ;;  %v803_v25 = vadd.f32 %v771_v15, %v4012_v53  ;;  %v773_v26 = vmul.f32 0.044715, %v741_v16  ;;  %v775_v27 = vmul.f32 0.044715, %v743_v17  ;;  %v605_v28 = vpop.f32.mrb[5].mxu0  ;;  %v678_v29 = vpop.f32.mrb[5].mxu1 }
 0x10d   : > { %v802_v30 = vadd.f32 %v770_v18, %v4015_v56  ;;  %v804_v31 = vadd.f32 %v772_v19, %v4018_v57  ;;  %v774_v32 = vmul.f32 0.044715, %v742_v20  ;;  %v776_v33 = vmul.f32 0.044715, %v744_v21  ;;  %v607_v34 = vpop.f32.mrb[6].mxu0  ;;  %v680_v35 = vpop.f32.mrb[6].mxu1 }
 0x10e   : > { %v833_v36 = vmul.f32 0.7978846, %v801_v24  ;;  %v835_v37 = vmul.f32 0.7978846, %v803_v25  ;;  %v805_v38 = vadd.f32 %v773_v26, %v4025_v62  ;;  %v807_v43 = vadd.f32 %v775_v27, %v4028_v63  ;;  %v609_v50 = vpop.f32.mrb[7].mxu0  ;;  %v682_v51 = vpop.f32.mrb[7].mxu1 }
 0x10f   : > { %v834_v54 = vmul.f32 0.7978846, %v802_v30  ;;  %v836_v55 = vmul.f32 0.7978846, %v804_v31  ;;  %v806_v58 = vadd.f32 %v774_v32, %v4035_v4  ;;  %v808_v59 = vadd.f32 %v776_v33, %v4038_v5 }
 0x110   : > { %3515 = vtanh.f32 %v833_v36  ;;  %v837_v60 = vmul.f32 0.7978846, %v805_v38  ;;  %v839_v61 = vmul.f32 0.7978846, %v807_v43  ;;  %v4065_v0 = vadd.f32 %v603_v22, %v3994_v46 }
 0x111   : > { %3517 = vtanh.f32 %v835_v37  ;;  %v838_v1 = vmul.f32 0.7978846, %v806_v58  ;;  %v840_v2 = vmul.f32 0.7978846, %v808_v59  ;;  %v4068_v3 = vadd.f32 %v676_v23, %v3998_v47 }
 0x112   : > { %3519 = vtanh.f32 %v834_v54  ;;  %v713_v6 = vmul.f32 %v4065_v0, %v4065_v0  ;;  %v4073_v7 = vadd.f32 %v605_v28, %v4002_v48  ;;  %v4076_v8 = vadd.f32 %v678_v29, %v4006_v49 }
 0x113   : > { %3521 = vtanh.f32 %v836_v55  ;;  %v715_v9 = vmul.f32 %v4068_v3, %v4068_v3  ;;  %v4081_v10 = vadd.f32 %v607_v34, %v3994_v46  ;;  %v4084_v11 = vadd.f32 %v680_v35, %v3998_v47  ;;  %v4086_v12 = vpop.f32.mrb[8].mxu0  ;;  %v4088_v13 = vpop.f32.mrb[8].mxu1 }
 0x114   : > { %3523 = vtanh.f32 %v837_v60  ;;  %v745_v14 = vmul.f32 %v713_v6, %v4065_v0  ;;  %v714_v15 = vmul.f32 %v4073_v7, %v4073_v7  ;;  %v716_v16 = vmul.f32 %v4076_v8, %v4076_v8  ;;  %v4095_v17 = vpop.f32.mrb[9].mxu0  ;;  %v4097_v18 = vpop.f32.mrb[9].mxu1 }
 0x115   : > { %3525 = vtanh.f32 %v839_v61  ;;  %v747_v19 = vmul.f32 %v715_v9, %v4068_v3  ;;  %v717_v20 = vmul.f32 %v4081_v10, %v4081_v10  ;;  %v719_v21 = vmul.f32 %v4084_v11, %v4084_v11  ;;  %v4104_v22 = vpop.f32.mrb[10].mxu0  ;;  %v4106_v23 = vpop.f32.mrb[10].mxu1 }
 0x116   : > { %3527 = vtanh.f32 %v838_v1  ;;  %v777_v24 = vmul.f32 0.044715, %v745_v14  ;;  %v746_v25 = vmul.f32 %v714_v15, %v4073_v7  ;;  %v748_v26 = vmul.f32 %v716_v16, %v4076_v8  ;;  %v4110_v27 = vpop.f32.mrb[11].mxu0  ;;  %v4112_v28 = vpop.f32.mrb[11].mxu1 }
 0x117   : > { %3529 = vtanh.f32 %v840_v2  ;;  %v779_v29 = vmul.f32 0.044715, %v747_v19  ;;  %v749_v30 = vmul.f32 %v717_v20, %v4081_v10  ;;  %v751_v31 = vmul.f32 %v719_v21, %v4084_v11 }
 0x118   : > { %v809_v32 = vadd.f32 %v777_v24, %v4065_v0  ;;  %v778_v33 = vmul.f32 0.044715, %v746_v25  ;;  %v780_v34 = vmul.f32 0.044715, %v748_v26  ;;  %v4118_v35 = vadd.f32 %v609_v50, %v4002_v48 }
 0x119   : > { %v811_v36 = vadd.f32 %v779_v29, %v4068_v3  ;;  %v781_v37 = vmul.f32 0.044715, %v749_v30  ;;  %v783_v38 = vmul.f32 0.044715, %v751_v31  ;;  %v4122_v43 = vadd.f32 %v682_v51, %v4006_v49 }
 0x11a   : > { %v3516_v54 = vpop.eup %3515  ;;  %v841_v55 = vmul.f32 0.7978846, %v809_v32  ;;  %v810_v58 = vadd.f32 %v778_v33, %v4073_v7  ;;  %v812_v59 = vadd.f32 %v780_v34, %v4076_v8  ;;  %v718_v60 = vmul.f32 %v4118_v35, %v4118_v35 }
 0x11b   : > { %v3518_v61 = vpop.eup %3517  ;;  %v897_v1 = vadd.f32 1.0, %v3516_v54  ;;  %v843_v50 = vmul.f32 0.7978846, %v811_v36  ;;  %v813_v2 = vadd.f32 %v781_v37, %v4081_v10  ;;  %v815_v6 = vadd.f32 %v783_v38, %v4084_v11  ;;  %v4130_v9 = vpop.f32.mrb[12].mxu0 }
 0x11c   : > { %v4132_v51 = vpop.f32.mrb[12].mxu1  ;;  %v4134_v14 = vpop.eup %3519  ;;  %v899_v15 = vadd.f32 1.0, %v3518_v61  ;;  %3531 = vtanh.f32 %v841_v55  ;;  %v842_v16 = vmul.f32 0.7978846, %v810_v58  ;;  %v844_v19 = vmul.f32 0.7978846, %v812_v59 }
 0x11d   : > { %v4136_v20 = vpop.f32.mrb[13].mxu0  ;;  %v4138_v21 = vpop.eup %3521  ;;  %v929_v24 = vmul.f32 0.5, %v897_v1  ;;  %3533 = vtanh.f32 %v843_v50  ;;  %v845_v25 = vmul.f32 0.7978846, %v813_v2  ;;  %v847_v26 = vmul.f32 0.7978846, %v815_v6 }
 0x11e   : > { %v4140_v29 = vpop.f32.mrb[13].mxu1  ;;  %v3524_v30 = vpop.eup %3523  ;;  %v931_v31 = vmul.f32 0.5, %v899_v15  ;;  %3535 = vtanh.f32 %v842_v16  ;;  %v750_v32 = vmul.f32 %v718_v60, %v4118_v35  ;;  %v720_v33 = vmul.f32 %v4122_v43, %v4122_v43 }
 0x11f   : > { %v4145_v34 = vpop.f32.mrb[14].mxu0  ;;  %v4147_v36 = vpop.f32.mrb[14].mxu1  ;;  %v961_v38 = vmul.f32 %v929_v24, %v4009_v52  ;;  %v901_v54 = vadd.f32 1.0, %v3524_v30  ;;  %3537 = vtanh.f32 %v844_v19  ;;  %v4152_v55 = vadd.f32 %v4086_v12, %v3994_v46 }
 0x120   : > { %v3526_v37 = vpop.eup %3525  ;;  %v4154_v58 = vpop.f32.mrb[15].mxu0  ;;  %v963_v61 = vmul.f32 %v931_v31, %v4012_v53  ;;  %3539 = vtanh.f32 %v845_v25  ;;  %v782_v50 = vmul.f32 0.044715, %v750_v32  ;;  %v752_v6 = vmul.f32 %v720_v33, %v4122_v43 }
 0x121   : > { %v4156_v59 = vpop.f32.mrb[15].mxu1  ;;  %v4158_v60 = vpop.eup %3527  ;;  %v903_v1 = vadd.f32 1.0, %v3526_v37  ;;  %v933_v52 = vmul.f32 0.5, %v901_v54  ;;  %3541 = vtanh.f32 %v847_v26  ;;  %v721_v12 = vmul.f32 %v4152_v55, %v4152_v55 }
 0x122   : > { %v4161_v2 = vpop.eup %3529  ;;  %v814_v16 = vadd.f32 %v782_v50, %v4118_v35  ;;  %v4169_v19 = vadd.f32 %v4088_v13, %v3998_v47  ;;  %v4173_v53 = vadd.f32 %v4095_v17, %v4002_v48  ;;  %v784_v25 = vmul.f32 0.044715, %v752_v6 }
 0x123   : > { %v935_v15 = vmul.f32 0.5, %v903_v1  ;;  %v965_v24 = vmul.f32 %v933_v52, %v4025_v62  ;;  %v753_v26 = vmul.f32 %v721_v12, %v4152_v55  ;;  %v4179_v30 = vadd.f32 %v4097_v18, %v4006_v49 }
 0x124   : > { %v846_v32 = vmul.f32 0.7978846, %v814_v16  ;;  %v723_v13 = vmul.f32 %v4169_v19, %v4169_v19  ;;  %v722_v33 = vmul.f32 %v4173_v53, %v4173_v53  ;;  %v816_v62 = vadd.f32 %v784_v25, %v4122_v43 }
 0x125   : > { %v967_v31 = vmul.f32 %v935_v15, %v4028_v63  ;;  %v4186_v17 = vpack.c.bf16 %v965_v24, %v961_v38  ;;  %v785_v37 = vmul.f32 0.044715, %v753_v26  ;;  %v724_v54 = vmul.f32 %v4179_v30, %v4179_v30 }
 0x126   : > { %v4191_v1 = vpop.eup %3531  ;;  %3543 = vtanh.f32 %v846_v32  ;;  %v755_v63 = vmul.f32 %v723_v13, %v4169_v19  ;;  %v754_v50 = vmul.f32 %v722_v33, %v4173_v53  ;;  %v848_v6 = vmul.f32 0.7978846, %v816_v62 }
 0x127   : > { %v4193_v18 = vpack.c.bf16 %v967_v31, %v963_v61  ;;  %v4197_v52 = vpop.eup %3533  ;;  %v817_v38 = vadd.f32 %v785_v37, %v4152_v55  ;;  %v756_v12 = vmul.f32 %v724_v54, %v4179_v30  ;;  %v4203_v15 = vadd.f32 %v4104_v22, %v3994_v46 }
 0x128   : > { %v4205_v16 = vpop.eup %3535  ;;  %v787_v61 = vmul.f32 0.044715, %v755_v63  ;;  %v786_v24 = vmul.f32 0.044715, %v754_v50  ;;  %v4209_v25 = vadd.f32 %v4106_v23, %v3998_v47  ;;  %v4213_v26 = vadd.f32 %v4110_v27, %v4002_v48 }
 0x129   : > { %v4215_v31 = vpop.eup %3537  ;;  %3545 = vtanh.f32 %v848_v6  ;;  %v849_v32 = vmul.f32 0.7978846, %v817_v38  ;;  %v788_v13 = vmul.f32 0.044715, %v756_v12  ;;  %v725_v22 = vmul.f32 %v4203_v15, %v4203_v15 }
 0x12a   : > { %v4219_v33 = vpop.eup %3539  ;;  %v819_v62 = vadd.f32 %v787_v61, %v4169_v19  ;;  %v818_v37 = vadd.f32 %v786_v24, %v4173_v53  ;;  %v727_v23 = vmul.f32 %v4209_v25, %v4209_v25  ;;  %v726_v27 = vmul.f32 %v4213_v26, %v4213_v26 }
 0x12b   : > { %v4227_v54 = vpop.eup %3541  ;;  %3547 = vtanh.f32 %v849_v32  ;;  %v820_v63 = vadd.f32 %v788_v13, %v4179_v30  ;;  %v757_v50 = vmul.f32 %v725_v22, %v4203_v15  ;;  %v4233_v6 = vadd.f32 %v4112_v28, %v4006_v49 }
 0x12c   : > { %v851_v38 = vmul.f32 0.7978846, %v819_v62  ;;  %v850_v12 = vmul.f32 0.7978846, %v818_v37  ;;  %v759_v61 = vmul.f32 %v727_v23, %v4209_v25  ;;  %v758_v24 = vmul.f32 %v726_v27, %v4213_v26 }
 0x12d   : > { %v852_v45 = vmul.f32 0.7978846, %v820_v63  ;;  %v789_v42 = vmul.f32 0.044715, %v757_v50  ;;  %v728_v44 = vmul.f32 %v4233_v6, %v4233_v6  ;;  %v4241_v32 = vadd.f32 %v4130_v9, %v3994_v46 }
 0x12e   : > { %3549 = vtanh.f32 %v851_v38  ;;  %v791_v13 = vmul.f32 0.044715, %v759_v61  ;;  %v790_v22 = vmul.f32 0.044715, %v758_v24  ;;  %v4245_v28 = vadd.f32 %v4132_v51, %v3998_v47 }
 0x12f   : > { %3551 = vtanh.f32 %v850_v12  ;;  %v821_v62 = vadd.f32 %v789_v42, %v4203_v15  ;;  %v760_v37 = vmul.f32 %v728_v44, %v4233_v6  ;;  %v729_v23 = vmul.f32 %v4241_v32, %v4241_v32 }
 0x130   : > { %v4251_v27 = vpop.eup %3543  ;;  %3553 = vtanh.f32 %v852_v45  ;;  %v823_v9 = vadd.f32 %v791_v13, %v4209_v25  ;;  %v822_v63 = vadd.f32 %v790_v22, %v4213_v26  ;;  %v731_v50 = vmul.f32 %v4245_v28, %v4245_v28 }
 0x131   : > { %v853_v51 = vmul.f32 0.7978846, %v821_v62  ;;  %v792_v38 = vmul.f32 0.044715, %v760_v37  ;;  %v761_v12 = vmul.f32 %v729_v23, %v4241_v32  ;;  %v4260_v42 = vadd.f32 %v4136_v20, %v4002_v48 }
 0x132   : > { %v855_v44 = vmul.f32 0.7978846, %v823_v9  ;;  %v854_v61 = vmul.f32 0.7978846, %v822_v63  ;;  %v763_v24 = vmul.f32 %v731_v50, %v4245_v28  ;;  %v4265_v45 = vadd.f32 %v4140_v29, %v4006_v49 }
 0x133   : > { %v4267_v13 = vpop.eup %3545  ;;  %3555 = vtanh.f32 %v853_v51  ;;  %v824_v22 = vadd.f32 %v792_v38, %v4233_v6  ;;  %v793_v62 = vmul.f32 0.044715, %v761_v12  ;;  %v730_v37 = vmul.f32 %v4260_v42, %v4260_v42 }
 0x134   : > { %3557 = vtanh.f32 %v855_v44  ;;  %v795_v20 = vmul.f32 0.044715, %v763_v24  ;;  %v732_v23 = vmul.f32 %v4265_v45, %v4265_v45  ;;  %v4276_v9 = vadd.f32 %v4145_v34, %v3994_v46 }
 0x135   : > { %v4278_v29 = vpop.eup %3547  ;;  %3559 = vtanh.f32 %v854_v61  ;;  %v856_v63 = vmul.f32 0.7978846, %v824_v22  ;;  %v825_v50 = vadd.f32 %v793_v62, %v4241_v32  ;;  %v762_v51 = vmul.f32 %v730_v37, %v4260_v42 }
 0x136   : > { %v827_v38 = vadd.f32 %v795_v20, %v4245_v28  ;;  %v764_v12 = vmul.f32 %v732_v23, %v4265_v45  ;;  %v733_v44 = vmul.f32 %v4276_v9, %v4276_v9  ;;  %v4288_v24 = vadd.f32 %v4147_v36, %v3998_v47 }
 0x137   : > { %3561 = vtanh.f32 %v856_v63  ;;  %v857_v46 = vmul.f32 0.7978846, %v825_v50  ;;  %v794_v34 = vmul.f32 0.044715, %v762_v51  ;;  %v4292_v61 = vadd.f32 %v4154_v58, %v4002_v48 }
 0x138   : > { %4922 = vst [vmem:[#allocation4_spill] sm:$0xff] %v4288_v24  ;;  %v4294_v22 = vpop.eup %3549  ;;  %v859_v62 = vmul.f32 0.7978846, %v827_v38  ;;  %v796_v37 = vmul.f32 0.044715, %v764_v12  ;;  %v765_v20 = vmul.f32 %v733_v44, %v4276_v9  ;;  %v735_v23 = vmul.f32 %v4288_v24, %v4288_v24 }
 0x139   : > { %v4299_v41 = vpop.eup %3551  ;;  %3563 = vtanh.f32 %v857_v46  ;;  %v826_v47 = vadd.f32 %v794_v34, %v4260_v42  ;;  %v734_v36 = vmul.f32 %v4292_v61, %v4292_v61  ;;  %v4306_v48 = vadd.f32 %v4156_v59, %v4006_v49 }
 0x13a   : > { %v4308_v58 = vpop.eup %3553  ;;  %3565 = vtanh.f32 %v859_v62  ;;  %v828_v63 = vadd.f32 %v796_v37, %v4265_v45  ;;  %v797_v50 = vmul.f32 0.044715, %v765_v20  ;;  %v767_v51 = vmul.f32 %v735_v23, %v4288_v24 }
 0x13b   : > { %v858_v38 = vmul.f32 0.7978846, %v826_v47  ;;  %v766_v12 = vmul.f32 %v734_v36, %v4292_v61  ;;  %v736_v44 = vmul.f32 %v4306_v48, %v4306_v48  ;;  %v898_v46 = vadd.f32 1.0, %v4134_v14 }
 0x13c   : > { %v860_v34 = vmul.f32 0.7978846, %v828_v63  ;;  %v829_v49 = vadd.f32 %v797_v50, %v4276_v9  ;;  %v799_v59 = vmul.f32 0.044715, %v767_v51  ;;  %v902_v39 = vadd.f32 1.0, %v4158_v60 }
 0x13d   : > { %v4318_v62 = vpop.eup %3555  ;;  %3567 = vtanh.f32 %v858_v38  ;;  %v798_v37 = vmul.f32 0.044715, %v766_v12  ;;  %v768_v20 = vmul.f32 %v736_v44, %v4306_v48  ;;  %v930_v23 = vmul.f32 0.5, %v898_v46 }
 0x13e   : > { %v4321_v47 = vpop.eup %3557  ;;  %3569 = vtanh.f32 %v860_v34  ;;  %v861_v36 = vmul.f32 0.7978846, %v829_v49  ;;  %v831_v40 = vadd.f32 %v799_v59, %v4288_v24  ;;  %v934_v14 = vmul.f32 0.5, %v902_v39 }
 0x13f   : > { %v4324_v63 = vpop.eup %3559  ;;  %v830_v50 = vadd.f32 %v798_v37, %v4292_v61  ;;  %v800_v51 = vmul.f32 0.044715, %v768_v20  ;;  %v962_v60 = vmul.f32 %v930_v23, %v4015_v56  ;;  %v900_v38 = vadd.f32 1.0, %v4138_v21 }
 0x140   : > { %3571 = vtanh.f32 %v861_v36  ;;  %v863_v12 = vmul.f32 0.7978846, %v831_v40  ;;  %v966_v44 = vmul.f32 %v934_v14, %v4035_v4  ;;  %v904_v46 = vadd.f32 1.0, %v4161_v2  ;;  %v3323_v40 = vld [vmem:[%s4908_s3 + $0x8] ss:$24 sps:$4 sm:$0xff]  }
 0x141   : > { %v4331_v34 = vpop.eup %3561  ;;  %v862_v49 = vmul.f32 0.7978846, %v830_v50  ;;  %v832_v39 = vadd.f32 %v800_v51, %v4306_v48  ;;  %v932_v59 = vmul.f32 0.5, %v900_v38  ;;  %v906_v24 = vadd.f32 1.0, %v4205_v16  ;;  %v3331_v16 = vld [vmem:[%s4908_s3 + $0x3c] ss:$24 sps:$4 sm:$0xff]  }
 0x142   : > { %3573 = vtanh.f32 %v863_v12  ;;  %v4335_v37 = vpack.c.bf16 %v966_v44, %v962_v60  ;;  %v936_v56 = vmul.f32 0.5, %v904_v46  ;;  %v910_v4 = vadd.f32 1.0, %v4251_v27 }
 0x143   : > { %v4341_v21 = vpop.eup %3563  ;;  %3575 = vtanh.f32 %v862_v49  ;;  %v864_v2 = vmul.f32 0.7978846, %v832_v39  ;;  %v964_v20 = vmul.f32 %v932_v59, %v4018_v57  ;;  %v938_v23 = vmul.f32 0.5, %v906_v24 }
 0x144   : > { %v4347_v36 = vpop.eup %3565  ;;  %2193 = vmatprep.mubr.bf16.mxu1 %v4335_v37  ;;  %v968_v14 = vmul.f32 %v936_v56, %v4038_v5  ;;  %v942_v50 = vmul.f32 0.5, %v910_v4  ;;  %v908_v27 = vadd.f32 1.0, %v4215_v31  ;;  %v912_v51 = vadd.f32 1.0, %v4267_v13  ;;  %v3326_v5 = vld [vmem:[%s4908_s3 + $0x10] ss:$24 sps:$4 sm:$0xff]  }
 0x145   : > { %3577 = vtanh.f32 %v864_v2  ;;  %2194 = vmatmul.mubr.bf16.vlgmr.msra.gmra.mrb[16].mxu1 %v4186_v17  ;;  %v970_v57 = vmul.f32 %v938_v23, %v4073_v7  ;;  %v905_v60 = vadd.f32 1.0, %v4191_v1  ;;  %v909_v24 = vadd.f32 1.0, %v4219_v33  ;;  %v3329_v31 = vld [vmem:[%s4908_s3 + $0x38] ss:$24 sps:$4 sm:$0xff]   ;;  %v3334_v1 = vld [vmem:[%s4908_s3 + $0x44] ss:$24 sps:$4 sm:$0xff]  }
 0x146   : > { %v4357_v38 = vpack.c.bf16 %v968_v14, %v964_v20  ;;  %2308 = vmatpush1.bf16.msra.mxu1 %v3323_v40  ;;  %v974_v13 = vmul.f32 %v942_v50, %v4118_v35  ;;  %v940_v12 = vmul.f32 0.5, %v908_v27  ;;  %v944_v44 = vmul.f32 0.5, %v912_v51  ;;  %v3337_v4 = vld [vmem:[%s4908_s3 + $0x6c] ss:$24 sps:$4 sm:$0xff]  }
 0x147   : > { %v4366_v7 = vpop.eup %3567  ;;  %2309 = vmatprep.subr.bf16.mxu1 %v3331_v16  ;;  %v937_v33 = vmul.f32 0.5, %v905_v60  ;;  %v941_v46 = vmul.f32 0.5, %v909_v24  ;;  %v907_v49 = vadd.f32 1.0, %v4197_v52  ;;  %v911_v39 = vadd.f32 1.0, %v4227_v54  ;;  %v3332_v52 = vld [vmem:[%s4908_s3 + $0x40] ss:$24 sps:$4 sm:$0xff]  }
 0x148   : > { %v4373_v59 = vpop.eup %3569  ;;  %2266 = vmatprep.mubr.bf16.mxu0 %v4357_v38  ;;  %v4376_v35 = vpack.c.bf16 %v974_v13, %v970_v57  ;;  %v972_v56 = vmul.f32 %v940_v12, %v4076_v8  ;;  %v976_v40 = vmul.f32 %v944_v44, %v4122_v43  ;;  %v914_v2 = vadd.f32 1.0, %v4299_v41  ;;  %v3335_v41 = vld [vmem:[%s4908_s3 + $0x68] ss:$24 sps:$4 sm:$0xff]  }
 0x149   : > { %2267 = vmatmul.mubr.bf16.vlgmr.msra.gmra.mrb[16].mxu0 %v4193_v18  ;;  %v969_v54 = vmul.f32 %v937_v33, %v4065_v0  ;;  %v973_v20 = vmul.f32 %v941_v46, %v4081_v10  ;;  %v939_v16 = vmul.f32 0.5, %v907_v49  ;;  %v943_v8 = vmul.f32 0.5, %v911_v39  ;;  %v3340_v0 = vld [vmem:[%s4908_s3 + $0x74] ss:$24 sps:$4 sm:$0xff]  }
 0x14a   : > { %v4390_v23 = vpop.eup %3571  ;;  %2454 = vmatpush1.bf16.msra.mxu0 %v3326_v5  ;;  %2310 = vmatpush1.bf16.msra.mxu1 %v3329_v31  ;;  %v4392_v43 = vpack.c.bf16 %v976_v40, %v972_v56  ;;  %v918_v14 = vadd.f32 1.0, %v4324_v63  ;;  %v946_v50 = vmul.f32 0.5, %v914_v2  ;;  %v916_v27 = vadd.f32 1.0, %v4308_v58  ;;  %v3343_v63 = vld [vmem:[%s4908_s3 + $0x9c] ss:$24 sps:$4 sm:$0xff]  }
 0x14b   : > { %2455 = vmatprep.subr.bf16.mxu0 %v3334_v1  ;;  %2203 = vmatprep.mubr.bf16.mxu1 %v4376_v35  ;;  %v4403_v10 = vpack.c.bf16 %v973_v20, %v969_v54  ;;  %v971_v51 = vmul.f32 %v939_v16, %v4068_v3  ;;  %v975_v57 = vmul.f32 %v943_v8, %v4084_v11  ;;  %v920_v60 = vadd.f32 1.0, %v4331_v34  ;;  %v3338_v1 = vld [vmem:[%s4908_s3 + $0x70] ss:$24 sps:$4 sm:$0xff]  }
 0x14c   : > { %v4411_v58 = vpop.eup %3573  ;;  %2276 = vmatprep.mubr.bf16.mxu0 %v4392_v43  ;;  %2311 = vmatprep.subr.bf16.mxu1 %v3337_v4  ;;  %v950_v24 = vmul.f32 0.5, %v918_v14  ;;  %v978_v5 = vmul.f32 %v946_v50, %v4173_v53  ;;  %v948_v31 = vmul.f32 0.5, %v916_v27  ;;  %v913_v13 = vadd.f32 1.0, %v4278_v29  ;;  %v3341_v53 = vld [vmem:[%s4908_s3 + $0x98] ss:$24 sps:$4 sm:$0xff]  }
 0x14d   : > { %v3576_v3 = vpop.eup %3575  ;;  %2204 = vmatmul.mubr.bf16.gmra.mrb[20].mxu1 %v4403_v10  ;;  %v4417_v11 = vpack.c.bf16 %v975_v57, %v971_v51  ;;  %v952_v12 = vmul.f32 0.5, %v920_v60  ;;  %v917_v44 = vadd.f32 1.0, %v4318_v62  ;;  %v915_v34 = vadd.f32 1.0, %v4294_v22  ;;  %v3346_v22 = vld [vmem:[%s4908_s3 + $0xa4] ss:$24 sps:$4 sm:$0xff]  }
 0x14e   : > { %2456 = vmatpush1.bf16.msra.mxu0 %v3332_v52  ;;  %2312 = vmatpush1.bf16.msra.mxu1 %v3335_v41  ;;  %v982_v29 = vmul.f32 %v950_v24, %v4213_v26  ;;  %v980_v33 = vmul.f32 %v948_v31, %v4179_v30  ;;  %v945_v46 = vmul.f32 0.5, %v913_v13  ;;  %v919_v49 = vadd.f32 1.0, %v4321_v47  ;;  %v3349_v30 = vld [vmem:[%s4908_s3 + $0xcc] ss:$24 sps:$4 sm:$0xff]   ;;  %v3355_v27 = vld [vmem:[%s4908_s3 + $0xfc] ss:$24 sps:$4 sm:$0xff]  }
 0x14f   : > { %v3578_v62 = vpop.eup %3577  ;;  %2457 = vmatprep.subr.bf16.mxu0 %v3340_v0  ;;  %2313 = vmatprep.subr.bf16.mxu1 %v3343_v63  ;;  %v984_v39 = vmul.f32 %v952_v12, %v4233_v6  ;;  %v949_v56 = vmul.f32 0.5, %v917_v44  ;;  %v947_v40 = vmul.f32 0.5, %v915_v34  ;;  %v922_v4 = vadd.f32 1.0, %v4366_v7  ;;  %v3344_v6 = vld [vmem:[%s4908_s3 + $0xa0] ss:$24 sps:$4 sm:$0xff]  }
 0x150   : > { %v4435_v2 = vpack.c.bf16 %v982_v29, %v978_v5  ;;  %v977_v26 = vmul.f32 %v945_v46, %v4152_v55  ;;  %v951_v47 = vmul.f32 0.5, %v919_v49  ;;  %v926_v52 = vadd.f32 1.0, %v3576_v3  ;;  %v3347_v55 = vld [vmem:[%s4908_s3 + $0xc8] ss:$24 sps:$4 sm:$0xff]   ;;  %v4923_v29 = vld [vmem:[#allocation4_spill] sm:$0xff] }
 0x151   : > { %2277 = vmatmul.mubr.bf16.gmra.mrb[20].mxu0 %v4417_v11  ;;  %v4445_v54 = vpack.c.bf16 %v984_v39, %v980_v33  ;;  %v981_v7 = vmul.f32 %v949_v56, %v4203_v15  ;;  %v979_v20 = vmul.f32 %v947_v40, %v4169_v19  ;;  %v954_v16 = vmul.f32 0.5, %v922_v4  ;;  %v3352_v19 = vld [vmem:[%s4908_s3 + $0xd4] ss:$24 sps:$4 sm:$0xff]   ;;  %v3359_v33 = vld [vmem:[%s4908_s3 + $0x128] ss:$24 sps:$4 sm:$0xff]  }
 0x152   : > { %2458 = vmatpush1.bf16.msra.mxu0 %v3338_v1  ;;  %2314 = vmatpush1.bf16.msra.mxu1 %v3341_v53  ;;  %v983_v8 = vmul.f32 %v951_v47, %v4209_v25  ;;  %v958_v41 = vmul.f32 0.5, %v926_v52  ;;  %v924_v14 = vadd.f32 1.0, %v4373_v59  ;;  %v928_v50 = vadd.f32 1.0, %v3578_v62  ;;  %v3364_v46 = vld [vmem:[%s4908_s3 + $0x134] ss:$24 sps:$4 sm:$0xff]  }
 0x153   : > { %2459 = vmatprep.subr.bf16.mxu0 %v3346_v22  ;;  %2213 = vmatprep.mubr.bf16.mxu1 %v4435_v2  ;;  %v4458_v15 = vpack.c.bf16 %v981_v7, %v977_v26  ;;  %v986_v0 = vmul.f32 %v954_v16, %v4260_v42  ;;  %v921_v25 = vadd.f32 1.0, %v4341_v21  ;;  %v925_v59 = vadd.f32 1.0, %v4390_v23  ;;  %v3350_v21 = vld [vmem:[%s4908_s3 + $0xd0] ss:$24 sps:$4 sm:$0xff]   ;;  %v3367_v49 = vld [vmem:[%s4908_s3 + $0x15c] ss:$24 sps:$4 sm:$0xff]  }
 0x154   : > { %2286 = vmatprep.mubr.bf16.mxu0 %v4445_v54  ;;  %2315 = vmatprep.subr.bf16.mxu1 %v3349_v30  ;;  %v4467_v51 = vpack.c.bf16 %v983_v8, %v979_v20  ;;  %v990_v57 = vmul.f32 %v958_v41, %v4292_v61  ;;  %v956_v63 = vmul.f32 0.5, %v924_v14  ;;  %v960_v60 = vmul.f32 0.5, %v928_v50  ;;  %v3353_v61 = vld [vmem:[%s4908_s3 + $0xf8] ss:$24 sps:$4 sm:$0xff]   ;;  %v3370_v39 = vld [vmem:[%s4908_s3 + $0x164] ss:$24 sps:$4 sm:$0xff]  }
 0x155   : > { %2214 = vmatmul.mubr.bf16.gmra.mrb[24].mxu1 %v4458_v15  ;;  %v953_v24 = vmul.f32 0.5, %v921_v25  ;;  %v957_v5 = vmul.f32 0.5, %v925_v59  ;;  %v923_v31 = vadd.f32 1.0, %v4347_v36  ;;  %v927_v42 = vadd.f32 1.0, %v4411_v58  ;;  %v3358_v36 = vld [vmem:[%s4908_s3 + $0x104] ss:$24 sps:$4 sm:$0xff]  }
 0x156   : > { %2460 = vmatpush1.bf16.msra.mxu0 %v3344_v6  ;;  %2316 = vmatpush1.bf16.msra.mxu1 %v3347_v55  ;;  %v4479_v23 = vpack.c.bf16 %v990_v57, %v986_v0  ;;  %v988_v13 = vmul.f32 %v956_v63, %v4265_v45  ;;  %v992_v3 = vmul.f32 %v960_v60, %v4306_v48  ;;  %v3361_v45 = vld [vmem:[%s4908_s3 + $0x12c] ss:$24 sps:$4 sm:$0xff]   ;;  %v3362_v62 = vld [vmem:[%s4908_s3 + $0x130] ss:$24 sps:$4 sm:$0xff]   ;;  %v3368_v40 = vld [vmem:[%s4908_s3 + $0x160] ss:$24 sps:$4 sm:$0xff]  }
 0x157   : > { %2461 = vmatprep.subr.bf16.mxu0 %v3352_v19  ;;  %2317 = vmatprep.subr.bf16.mxu1 %v3355_v27  ;;  %v985_v58 = vmul.f32 %v953_v24, %v4241_v32  ;;  %v989_v12 = vmul.f32 %v957_v5, %v4276_v9  ;;  %v955_v44 = vmul.f32 0.5, %v923_v31  ;;  %v959_v34 = vmul.f32 0.5, %v927_v42  ;;  %v3356_v9 = vld [vmem:[%s4908_s3 + $0x100] ss:$24 sps:$4 sm:$0xff]   ;;  %v3373_v56 = vld [vmem:[%s4908_s3 + $0x18c] ss:$24 sps:$4 sm:$0xff]  }
 0x158   : > { %2223 = vmatprep.mubr.bf16.mxu1 %v4479_v23  ;;  %v4489_v1 = vpack.c.bf16 %v992_v3, %v988_v13  ;;  %v3365_v22 = vld [vmem:[%s4908_s3 + $0x158] ss:$24 sps:$4 sm:$0xff]   ;;  %v3371_v4 = vld [vmem:[%s4908_s3 + $0x188] ss:$24 sps:$4 sm:$0xff]   ;;  %v3376_v30 = vld [vmem:[%s4908_s3 + $0x194] ss:$24 sps:$4 sm:$0xff]  }
 0x159   : > { %2287 = vmatmul.mubr.bf16.gmra.mrb[24].mxu0 %v4467_v51  ;;  %v4495_v48 = vpack.c.bf16 %v989_v12, %v985_v58  ;;  %v987_v53 = vmul.f32 %v955_v44, %v4245_v28  ;;  %v991_v32 = vmul.f32 %v959_v34, %v4923_v29  ;;  %v3379_v26 = vld [vmem:[%s4908_s3 + $0x1bc] ss:$24 sps:$4 sm:$0xff]   ;;  %v3377_v47 = vld [vmem:[%s4908_s3 + $0x1b8] ss:$24 sps:$4 sm:$0xff]   ;;  %v3385_v6 = vld [vmem:[%s4908_s3 + $0x1ec] ss:$24 sps:$4 sm:$0xff]  }
 0x15a   : > { %2462 = vmatpush1.bf16.msra.mxu0 %v3350_v21  ;;  %2318 = vmatpush1.bf16.msra.mxu1 %v3353_v61  ;;  %v3382_v52 = vld [vmem:[%s4908_s3 + $0x1c4] ss:$24 sps:$4 sm:$0xff]   ;;  %v3380_v7 = vld [vmem:[%s4908_s3 + $0x1c0] ss:$24 sps:$4 sm:$0xff]   ;;  %v3388_v16 = vld [vmem:[%s4908_s3 + $0x1f4] ss:$24 sps:$4 sm:$0xff]  }
 0x15b   : > { %2463 = vmatprep.subr.bf16.mxu0 %v3358_v36  ;;  %2296 = vmatprep.mubr.bf16.mxu0 %v4489_v1  ;;  %v4509_v28 = vpack.c.bf16 %v991_v32, %v987_v53  ;;  %v3383_v20 = vld [vmem:[%s4908_s3 + $0x1e8] ss:$24 sps:$4 sm:$0xff]   ;;  %v3391_v55 = vld [vmem:[%s4908_s3 + $0x21c] ss:$24 sps:$4 sm:$0xff]   ;;  %v3389_v41 = vld [vmem:[%s4908_s3 + $0x218] ss:$24 sps:$4 sm:$0xff]  }
 0x15c   : > { %2319 = vmatprep.subr.bf16.mxu1 %v3361_v45  ;;  %v3386_v8 = vld [vmem:[%s4908_s3 + $0x1f0] ss:$24 sps:$4 sm:$0xff]   ;;  %v3394_v14 = vld [vmem:[%s4908_s3 + $0x224] ss:$24 sps:$4 sm:$0xff]   ;;  %v3392_v19 = vld [vmem:[%s4908_s3 + $0x220] ss:$24 sps:$4 sm:$0xff]  }
 0x15d   : > { %2224 = vmatmul.mubr.bf16.gmra.mrb[28].mxu1 %v4495_v48  ;;  %v3397_v50 = vld [vmem:[%s4908_s3 + $0x24c] ss:$24 sps:$4 sm:$0xff]   ;;  %v3395_v27 = vld [vmem:[%s4908_s3 + $0x248] ss:$24 sps:$4 sm:$0xff]   ;;  %v3403_v25 = vld [vmem:[%s4908_s3 + $0x27c] ss:$24 sps:$4 sm:$0xff]  }
 0x15e   : > { %2464 = vmatpush1.bf16.msra.mxu0 %v3356_v9  ;;  %2320 = vmatpush1.bf16.msra.mxu1 %v3359_v33  ;;  %v3400_v0 = vld [vmem:[%s4908_s3 + $0x254] ss:$24 sps:$4 sm:$0xff]   ;;  %v3398_v59 = vld [vmem:[%s4908_s3 + $0x250] ss:$24 sps:$4 sm:$0xff]   ;;  %v3406_v63 = vld [vmem:[%s4908_s3 + $0x284] ss:$24 sps:$4 sm:$0xff]  }
 0x15f   : > { %2465 = vmatprep.subr.bf16.mxu0 %v3364_v46  ;;  %2339 = vmatprep.mubr.bf16.mxu1 %v4335_v37  ;;  %v3401_v57 = vld [vmem:[%s4908_s3 + $0x278] ss:$24 sps:$4 sm:$0xff]   ;;  %v3409_v60 = vld [vmem:[%s4908_s3 + $0x2ac] ss:$24 sps:$4 sm:$0xff]   ;;  %v3407_v5 = vld [vmem:[%s4908_s3 + $0x2a8] ss:$24 sps:$4 sm:$0xff]  }
 0x160   : > { %2321 = vmatprep.subr.bf16.mxu1 %v3367_v49  ;;  %v3404_v24 = vld [vmem:[%s4908_s3 + $0x280] ss:$24 sps:$4 sm:$0xff]   ;;  %v3412_v31 = vld [vmem:[%s4908_s3 + $0x2b4] ss:$24 sps:$4 sm:$0xff]   ;;  %v3410_v21 = vld [vmem:[%s4908_s3 + $0x2b0] ss:$24 sps:$4 sm:$0xff]  }
 0x161   : > { %2297 = vmatmul.mubr.bf16.gmra.mrb[28].mxu0 %v4509_v28  ;;  %v3415_v42 = vld [vmem:[%s4908_s3 + $0x2dc] ss:$24 sps:$4 sm:$0xff]   ;;  %v3413_v61 = vld [vmem:[%s4908_s3 + $0x2d8] ss:$24 sps:$4 sm:$0xff]   ;;  %v3421_v3 = vld [vmem:[%s4908_s3 + $0x30c] ss:$24 sps:$4 sm:$0xff]  }
 0x162   : > { %2466 = vmatpush1.bf16.msra.mxu0 %v3362_v62  ;;  %2485 = vmatprep.mubr.bf16.mxu0 %v4335_v37  ;;  %v3374_v37 = vld [vmem:[%s4908_s3 + $0x190] ss:$24 sps:$4 sm:$0xff]   ;;  %v3418_v13 = vld [vmem:[%s4908_s3 + $0x2e4] ss:$24 sps:$4 sm:$0xff]   ;;  %v3416_v36 = vld [vmem:[%s4908_s3 + $0x2e0] ss:$24 sps:$4 sm:$0xff]  }
 0x163   : > { %2467 = vmatprep.subr.bf16.mxu0 %v3370_v39  ;;  %2322 = vmatpush1.bf16.msra.mxu1 %v3365_v22  ;;  %v3424_v58 = vld [vmem:[%s4908_s3 + $0x314] ss:$24 sps:$4 sm:$0xff]   ;;  %v3419_v12 = vld [vmem:[%s4908_s3 + $0x308] ss:$24 sps:$4 sm:$0xff]   ;;  %v3430_v45 = vld [vmem:[%s4908_s3 + $0x344] ss:$24 sps:$4 sm:$0xff]  }
 0x164   : > { %2323 = vmatprep.subr.bf16.mxu1 %v3373_v56  ;;  %v3427_v44 = vld [vmem:[%s4908_s3 + $0x33c] ss:$24 sps:$4 sm:$0xff]   ;;  %v3422_v34 = vld [vmem:[%s4908_s3 + $0x310] ss:$24 sps:$4 sm:$0xff]   ;;  %v3433_v29 = vld [vmem:[%s4908_s3 + $0x36c] ss:$24 sps:$4 sm:$0xff]  }
 0x165   : > { %v3425_v53 = vld [vmem:[%s4908_s3 + $0x338] ss:$24 sps:$4 sm:$0xff]   ;;  %v3436_v9 = vld [vmem:[%s4908_s3 + $0x374] ss:$24 sps:$4 sm:$0xff]   ;;  %v3442_v46 = vld [vmem:[%s4908_s3 + $0x3a4] ss:$24 sps:$4 sm:$0xff]  }
 0x166   : > { %2468 = vmatpush1.bf16.msra.mxu0 %v3368_v40  ;;  %v3428_v32 = vld [vmem:[%s4908_s3 + $0x340] ss:$24 sps:$4 sm:$0xff]   ;;  %v3434_v33 = vld [vmem:[%s4908_s3 + $0x370] ss:$24 sps:$4 sm:$0xff]   ;;  %v3445_v62 = vld [vmem:[%s4908_s3 + $0x3cc] ss:$24 sps:$4 sm:$0xff]  }
 0x167   : > { %2469 = vmatprep.subr.bf16.mxu0 %v3376_v30  ;;  %2324 = vmatpush1.bf16.msra.mxu1 %v3371_v4  ;;  %v3437_v49 = vld [vmem:[%s4908_s3 + $0x398] ss:$24 sps:$4 sm:$0xff]   ;;  %v3448_v39 = vld [vmem:[%s4908_s3 + $0x3d4] ss:$24 sps:$4 sm:$0xff]   ;;  %v3454_v40 = vld [vmem:[%s4908_s3 + $0x404] ss:$24 sps:$4 sm:$0xff]  }
 0x168   : > { %2325 = vmatprep.subr.bf16.mxu1 %v3379_v26  ;;  %v3440_v22 = vld [vmem:[%s4908_s3 + $0x3a0] ss:$24 sps:$4 sm:$0xff]   ;;  %v3446_v56 = vld [vmem:[%s4908_s3 + $0x3d0] ss:$24 sps:$4 sm:$0xff]   ;;  %v3457_v30 = vld [vmem:[%s4908_s3 + $0x42c] ss:$24 sps:$4 sm:$0xff]  }
 0x169   : > { %v3449_v4 = vld [vmem:[%s4908_s3 + $0x3f8] ss:$24 sps:$4 sm:$0xff]  }
 0x16a   : > { %2470 = vmatpush1.bf16.msra.mxu0 %v3374_v37  ;;  %v3452_v26 = vld [vmem:[%s4908_s3 + $0x400] ss:$24 sps:$4 sm:$0xff]   ;;  %v3460_v37 = vld [vmem:[%s4908_s3 + $0x434] ss:$24 sps:$4 sm:$0xff]  }
 0x16b   : > { %2471 = vmatprep.subr.bf16.mxu0 %v3382_v52  ;;  %2326 = vmatpush1.bf16.msra.mxu1 %v3377_v47  ;;  %v3458_v47 = vld [vmem:[%s4908_s3 + $0x430] ss:$24 sps:$4 sm:$0xff]   ;;  %v3466_v52 = vld [vmem:[%s4908_s3 + $0x464] ss:$24 sps:$4 sm:$0xff]  }
 0x16c   : > { %2327 = vmatprep.subr.bf16.mxu1 %v3385_v6  ;;  %v3461_v6 = vld [vmem:[%s4908_s3 + $0x458] ss:$24 sps:$4 sm:$0xff]  }
 0x16e   : > { %2472 = vmatpush1.bf16.msra.mxu0 %v3380_v7  ;;  %v3469_v7 = vld [vmem:[%s4908_s3 + $0x48c] ss:$24 sps:$4 sm:$0xff]  }
 0x16f   : > { %2473 = vmatprep.subr.bf16.mxu0 %v3388_v16  ;;  %2328 = vmatpush1.bf16.msra.mxu1 %v3383_v20  ;;  %v3464_v20 = vld [vmem:[%s4908_s3 + $0x460] ss:$24 sps:$4 sm:$0xff]   ;;  %v3472_v16 = vld [vmem:[%s4908_s3 + $0x494] ss:$24 sps:$4 sm:$0xff]  }
 0x170   : > { %2329 = vmatprep.subr.bf16.mxu1 %v3391_v55  ;;  %v3475_v55 = vld [vmem:[%s4908_s3 + $0x4bc] ss:$24 sps:$4 sm:$0xff]  }
 0x172   : > { %2474 = vmatpush1.bf16.msra.mxu0 %v3386_v8  ;;  %v3478_v8 = vld [vmem:[%s4908_s3 + $0x4c4] ss:$24 sps:$4 sm:$0xff]  }
 0x173   : > { %2475 = vmatprep.subr.bf16.mxu0 %v3394_v14  ;;  %2330 = vmatpush1.bf16.msra.mxu1 %v3389_v41  ;;  %v3473_v41 = vld [vmem:[%s4908_s3 + $0x4b8] ss:$24 sps:$4 sm:$0xff]   ;;  %v3481_v14 = vld [vmem:[%s4908_s3 + $0x4ec] ss:$24 sps:$4 sm:$0xff]  }
 0x174   : > { %2331 = vmatprep.subr.bf16.mxu1 %v3397_v50  ;;  %v3476_v50 = vld [vmem:[%s4908_s3 + $0x4c0] ss:$24 sps:$4 sm:$0xff]  }
 0x176   : > { %2476 = vmatpush1.bf16.msra.mxu0 %v3392_v19  ;;  %v3484_v19 = vld [vmem:[%s4908_s3 + $0x4f4] ss:$24 sps:$4 sm:$0xff]  }
 0x177   : > { %2477 = vmatprep.subr.bf16.mxu0 %v3400_v0  ;;  %2332 = vmatpush1.bf16.msra.mxu1 %v3395_v27  ;;  %v3479_v27 = vld [vmem:[%s4908_s3 + $0x4e8] ss:$24 sps:$4 sm:$0xff]   ;;  %v3487_v0 = vld [vmem:[%s4908_s3 + $0x51c] ss:$24 sps:$4 sm:$0xff]  }
 0x178   : > { %2333 = vmatprep.subr.bf16.mxu1 %v3403_v25  ;;  %v3482_v25 = vld [vmem:[%s4908_s3 + $0x4f0] ss:$24 sps:$4 sm:$0xff]  }
 0x17a   : > { %2478 = vmatpush1.bf16.msra.mxu0 %v3398_v59  ;;  %v3490_v59 = vld [vmem:[%s4908_s3 + $0x524] ss:$24 sps:$4 sm:$0xff]  }
 0x17b   : > { %2479 = vmatprep.subr.bf16.mxu0 %v3406_v63  ;;  %2334 = vmatpush1.bf16.msra.mxu1 %v3401_v57  ;;  %v3485_v57 = vld [vmem:[%s4908_s3 + $0x518] ss:$24 sps:$4 sm:$0xff]   ;;  %v3493_v63 = vld [vmem:[%s4908_s3 + $0x54c] ss:$24 sps:$4 sm:$0xff]  }
 0x17c   : > { %2335 = vmatprep.subr.bf16.mxu1 %v3409_v60  ;;  %v3488_v60 = vld [vmem:[%s4908_s3 + $0x520] ss:$24 sps:$4 sm:$0xff]  }
 0x17e   : > { %2480 = vmatpush1.bf16.msra.mxu0 %v3404_v24  ;;  %v3496_v24 = vld [vmem:[%s4908_s3 + $0x554] ss:$24 sps:$4 sm:$0xff]  }
 0x17f   : > { %2481 = vmatprep.subr.bf16.mxu0 %v3412_v31  ;;  %2336 = vmatpush1.bf16.msra.mxu1 %v3407_v5  ;;  %v3491_v5 = vld [vmem:[%s4908_s3 + $0x548] ss:$24 sps:$4 sm:$0xff]   ;;  %v3499_v31 = vld [vmem:[%s4908_s3 + $0x57c] ss:$24 sps:$4 sm:$0xff]  }
 0x180   : > { %2337 = vmatprep.subr.bf16.mxu1 %v3415_v42  ;;  %v3494_v42 = vld [vmem:[%s4908_s3 + $0x550] ss:$24 sps:$4 sm:$0xff]  }
 0x182   : > { %2482 = vmatpush1.bf16.msra.mxu0 %v3410_v21  ;;  %v3502_v21 = vld [vmem:[%s4908_s3 + $0x584] ss:$24 sps:$4 sm:$0xff]  }
 0x183   : > { %2483 = vmatprep.subr.bf16.mxu0 %v3418_v13  ;;  %2338 = vmatpush1.bf16.msra.mxu1 %v3413_v61  ;;  %v3497_v61 = vld [vmem:[%s4908_s3 + $0x578] ss:$24 sps:$4 sm:$0xff]   ;;  %v3505_v13 = vld [vmem:[%s4908_s3 + $0x5ac] ss:$24 sps:$4 sm:$0xff]  }
 0x184   : > { %2380 = vmatprep.subr.bf16.mxu1 %v3421_v3  ;;  %v3500_v3 = vld [vmem:[%s4908_s3 + $0x580] ss:$24 sps:$4 sm:$0xff]  }
 0x186   : > { %2484 = vmatpush1.bf16.msra.mxu0 %v3416_v36  ;;  %2340 = vmatmul.mubr.bf16.vlgmr.msra.gmra.mrb[32].mxu1 %v4186_v17  ;;  %v3508_v36 = vld [vmem:[%s4908_s3 + $0x5b4] ss:$24 sps:$4 sm:$0xff]  }
 0x187   : > { %2526 = vmatprep.subr.bf16.mxu0 %v3424_v58  ;;  %2349 = vmatprep.mubr.bf16.mxu1 %v4376_v35  ;;  %v3503_v58 = vld [vmem:[%s4908_s3 + $0x5a8] ss:$24 sps:$4 sm:$0xff]  }
 0x188   : > { %2381 = vmatpush1.bf16.msra.mxu1 %v3419_v12  ;;  %v3511_v12 = vld [vmem:[%s4908_s3 + $0x5dc] ss:$24 sps:$4 sm:$0xff]  }
 0x189   : > { %2486 = vmatmul.mubr.bf16.vlgmr.msra.gmra.mrb[32].mxu0 %v4186_v17  ;;  %2382 = vmatprep.subr.bf16.mxu1 %v3427_v44  ;;  %v3431_v17 = vld [vmem:[%s4908_s3 + $0x368] ss:$24 sps:$4 sm:$0xff]  }
 0x18a   : > { %2495 = vmatprep.mubr.bf16.mxu0 %v4376_v35  ;;  %2527 = vmatpush1.bf16.msra.mxu0 %v3422_v34  ;;  %v3439_v35 = vld [vmem:[%s4908_s3 + $0x39c] ss:$24 sps:$4 sm:$0xff]   ;;  %v3506_v44 = vld [vmem:[%s4908_s3 + $0x5b0] ss:$24 sps:$4 sm:$0xff]  }
 0x18b   : > { %2528 = vmatprep.subr.bf16.mxu0 %v3430_v45  ;;  %v3514_v34 = vld [vmem:[%s4908_s3 + $0x5e4] ss:$24 sps:$4 sm:$0xff]   ;;  %v3509_v45 = vld [vmem:[%s4908_s3 + $0x5d8] ss:$24 sps:$4 sm:$0xff]  }
 0x18c   : > { %2383 = vmatpush1.bf16.msra.mxu1 %v3425_v53  ;;  %v3512_v53 = vld [vmem:[%s4908_s3 + $0x5e0] ss:$24 sps:$4 sm:$0xff]  }
 0x18d   : > { %2384 = vmatprep.subr.bf16.mxu1 %v3433_v29 }
 0x18e   : > { %2529 = vmatpush1.bf16.msra.mxu0 %v3428_v32  ;;  %2350 = vmatmul.mubr.bf16.gmra.mrb[36].mxu1 %v4403_v10 }
 0x18f   : > { %2530 = vmatprep.subr.bf16.mxu0 %v3436_v9  ;;  %2359 = vmatprep.mubr.bf16.mxu1 %v4435_v2 }
 0x190   : > { %2385 = vmatpush1.bf16.msra.mxu1 %v3431_v17 }
 0x191   : > { %2496 = vmatmul.mubr.bf16.gmra.mrb[36].mxu0 %v4403_v10  ;;  %2386 = vmatprep.subr.bf16.mxu1 %v3439_v35  ;;  %v3443_v10 = vld [vmem:[%s4908_s3 + $0x3c8] ss:$24 sps:$4 sm:$0xff]  }
 0x192   : > { %2505 = vmatprep.mubr.bf16.mxu0 %v4435_v2  ;;  %2531 = vmatpush1.bf16.msra.mxu0 %v3434_v33  ;;  %v3451_v2 = vld [vmem:[%s4908_s3 + $0x3fc] ss:$24 sps:$4 sm:$0xff]  }
 0x193   : > { %2532 = vmatprep.subr.bf16.mxu0 %v3442_v46 }
 0x194   : > { %2387 = vmatpush1.bf16.msra.mxu1 %v3437_v49 }
 0x195   : > { %2388 = vmatprep.subr.bf16.mxu1 %v3445_v62 }
 0x196   : > { %2533 = vmatpush1.bf16.msra.mxu0 %v3440_v22  ;;  %2360 = vmatmul.mubr.bf16.gmra.mrb[40].mxu1 %v4458_v15 }
 0x197   : > { %2534 = vmatprep.subr.bf16.mxu0 %v3448_v39  ;;  %2369 = vmatprep.mubr.bf16.mxu1 %v4479_v23 }
 0x198   : > { %2389 = vmatpush1.bf16.msra.mxu1 %v3443_v10 }
 0x199   : > { %2506 = vmatmul.mubr.bf16.gmra.mrb[40].mxu0 %v4458_v15  ;;  %2390 = vmatprep.subr.bf16.mxu1 %v3451_v2  ;;  %v3455_v15 = vld [vmem:[%s4908_s3 + $0x428] ss:$24 sps:$4 sm:$0xff]  }
 0x19a   : > { %2515 = vmatprep.mubr.bf16.mxu0 %v4479_v23  ;;  %2535 = vmatpush1.bf16.msra.mxu0 %v3446_v56  ;;  %v3463_v23 = vld [vmem:[%s4908_s3 + $0x45c] ss:$24 sps:$4 sm:$0xff]  }
 0x19b   : > { %2536 = vmatprep.subr.bf16.mxu0 %v3454_v40 }
 0x19c   : > { %2391 = vmatpush1.bf16.msra.mxu1 %v3449_v4 }
 0x19d   : > { %2392 = vmatprep.subr.bf16.mxu1 %v3457_v30 }
 0x19e   : > { %2537 = vmatpush1.bf16.msra.mxu0 %v3452_v26  ;;  %2370 = vmatmul.mubr.bf16.gmra.mrb[44].mxu1 %v4495_v48 }
 0x19f   : > { %2538 = vmatprep.subr.bf16.mxu0 %v3460_v37  ;;  %2412 = vmatprep.mubr.bf16.mxu1 %v4357_v38 }
 0x1a0   : > { %2393 = vmatpush1.bf16.msra.mxu1 %v3455_v15 }
 0x1a1   : > { %2516 = vmatmul.mubr.bf16.gmra.mrb[44].mxu0 %v4495_v48  ;;  %2394 = vmatprep.subr.bf16.mxu1 %v3463_v23  ;;  %v3467_v48 = vld [vmem:[%s4908_s3 + $0x488] ss:$24 sps:$4 sm:$0xff]  }
 0x1a2   : > { %2539 = vmatpush1.bf16.msra.mxu0 %v3458_v47  ;;  %2558 = vmatprep.mubr.bf16.mxu0 %v4357_v38  ;;  %v3470_v38 = vld [vmem:[%s4908_s3 + $0x490] ss:$24 sps:$4 sm:$0xff]  }
 0x1a3   : > { %2540 = vmatprep.subr.bf16.mxu0 %v3466_v52 }
 0x1a4   : > { %2395 = vmatpush1.bf16.msra.mxu1 %v3461_v6 }
 0x1a5   : > { %2396 = vmatprep.subr.bf16.mxu1 %v3469_v7 }
 0x1a6   : > { %2541 = vmatpush1.bf16.msra.mxu0 %v3464_v20 }
 0x1a7   : > { %2542 = vmatprep.subr.bf16.mxu0 %v3472_v16 }
 0x1a8   : > { %2397 = vmatpush1.bf16.msra.mxu1 %v3467_v48 }
 0x1a9   : > { %2398 = vmatprep.subr.bf16.mxu1 %v3475_v55 }
 0x1aa   : > { %2543 = vmatpush1.bf16.msra.mxu0 %v3470_v38 }
 0x1ab   : > { %2544 = vmatprep.subr.bf16.mxu0 %v3478_v8 }
 0x1ac   : > { %2399 = vmatpush1.bf16.msra.mxu1 %v3473_v41 }
 0x1ad   : > { %2400 = vmatprep.subr.bf16.mxu1 %v3481_v14 }
 0x1ae   : > { %2545 = vmatpush1.bf16.msra.mxu0 %v3476_v50 }
 0x1af   : > { %2546 = vmatprep.subr.bf16.mxu0 %v3484_v19 }
 0x1b0   : > { %2401 = vmatpush1.bf16.msra.mxu1 %v3479_v27 }
 0x1b1   : > { %2402 = vmatprep.subr.bf16.mxu1 %v3487_v0 }
 0x1b2   : > { %2547 = vmatpush1.bf16.msra.mxu0 %v3482_v25 }
 0x1b3   : > { %2548 = vmatprep.subr.bf16.mxu0 %v3490_v59 }
 0x1b4   : > { %2403 = vmatpush1.bf16.msra.mxu1 %v3485_v57 }
 0x1b5   : > { %2404 = vmatprep.subr.bf16.mxu1 %v3493_v63 }
 0x1b6   : > { %2549 = vmatpush1.bf16.msra.mxu0 %v3488_v60 }
 0x1b7   : > { %2550 = vmatprep.subr.bf16.mxu0 %v3496_v24 }
 0x1b8   : > { %2405 = vmatpush1.bf16.msra.mxu1 %v3491_v5 }
 0x1b9   : > { %2406 = vmatprep.subr.bf16.mxu1 %v3499_v31 }
 0x1ba   : > { %2551 = vmatpush1.bf16.msra.mxu0 %v3494_v42 }
 0x1bb   : > { %2552 = vmatprep.subr.bf16.mxu0 %v3502_v21 }
 0x1bc   : > { %2407 = vmatpush1.bf16.msra.mxu1 %v3497_v61 }
 0x1bd   : > { %2408 = vmatprep.subr.bf16.mxu1 %v3505_v13 }
 0x1be   : > { %2553 = vmatpush1.bf16.msra.mxu0 %v3500_v3 }
 0x1bf   : > { %2554 = vmatprep.subr.bf16.mxu0 %v3508_v36 }
 0x1c0   : > { %2409 = vmatpush1.bf16.msra.mxu1 %v3503_v58 }
 0x1c1   : > { %2410 = vmatprep.subr.bf16.mxu1 %v3511_v12 }
 0x1c2   : > { %2555 = vmatpush1.bf16.msra.mxu0 %v3506_v44 }
 0x1c3   : > { %2556 = vmatprep.subr.bf16.mxu0 %v3514_v34 }
 0x1c4   : > { %2411 = vmatpush1.bf16.msra.mxu1 %v3509_v45 }
 0x1c6   : > { %2557 = vmatpush1.bf16.msra.mxu0 %v3512_v53 }
 0x1c7   : > { %2413 = vmatmul.mubr.bf16.vlgmr.msra.gmra.mrb[32].mxu1 %v4193_v18 }
 0x1c8   : > { %2422 = vmatprep.mubr.bf16.mxu1 %v4392_v43 }
 0x1c9   : > { %2559 = vmatmul.mubr.bf16.vlgmr.msra.gmra.mrb[32].mxu0 %v4193_v18 }
 0x1ca   : > { %2568 = vmatprep.mubr.bf16.mxu0 %v4392_v43 }
 0x1cf   : > { %2423 = vmatmul.mubr.bf16.gmra.mrb[36].mxu1 %v4417_v11 }
 0x1d0   : > { %2432 = vmatprep.mubr.bf16.mxu1 %v4445_v54 }
 0x1d1   : > { %2569 = vmatmul.mubr.bf16.gmra.mrb[36].mxu0 %v4417_v11 }
 0x1d2   : > { %2578 = vmatprep.mubr.bf16.mxu0 %v4445_v54 }
 0x1d7   : > { %2433 = vmatmul.mubr.bf16.gmra.mrb[40].mxu1 %v4467_v51 }
 0x1d8   : > { %2442 = vmatprep.mubr.bf16.mxu1 %v4489_v1 }
 0x1d9   : > { %2579 = vmatmul.mubr.bf16.gmra.mrb[40].mxu0 %v4467_v51 }
 0x1da   : > { %2588 = vmatprep.mubr.bf16.mxu0 %v4489_v1 }
 0x1df   : > { %2443 = vmatmul.mubr.bf16.gmra.mrb[44].mxu1 %v4509_v28 }
 0x1e1   : > { %2589 = vmatmul.mubr.bf16.gmra.mrb[44].mxu0 %v4509_v28 }
 0x218   : > { %v2195_v18 = vpop.f32.mrb[16].mxu1 }
 0x219   : > { %v2197_v43 = vpop.f32.mrb[17].mxu1 }
 0x21a   : > { %v2199_v29 = vpop.f32.mrb[18].mxu1 }
 0x21b   : > { %v2201_v32 = vpop.f32.mrb[19].mxu1 }
 0x21c   : > { %v2268_v9 = vpop.f32.mrb[16].mxu0 }
 0x21d   : > { %v2269_v11 = vadd.f32 %v2268_v9, %v2195_v18  ;;  %v2270_v17 = vpop.f32.mrb[17].mxu0 }
 0x21e   : > { %v2271_v54 = vadd.f32 %v2270_v17, %v2197_v43  ;;  %v2272_v35 = vpop.f32.mrb[18].mxu0 }
 0x21f   : > { %v2273_v33 = vadd.f32 %v2272_v35, %v2199_v29  ;;  %v2274_v46 = vpop.f32.mrb[19].mxu0 }
 0x220   : > { %v2275_v49 = vadd.f32 %v2274_v46, %v2201_v32  ;;  %v2205_v62 = vpop.f32.mrb[20].mxu1  ;;  %v4924_v46 = vlaneseq }
 0x221   : > { %v2600_v51 = vadd.f32 %v2273_v33, %v2269_v11  ;;  %v2207_v22 = vpop.f32.mrb[21].mxu1 }
 0x222   : > { %v2613_v1 = vadd.f32 %v2275_v49, %v2271_v54  ;;  %v2209_v39 = vpop.f32.mrb[22].mxu1  ;;  %vm4853_vm0 = vcmp.lt.s32.totalorder %v4924_v46, 768 }
 0x223   : > { %v2211_v10 = vpop.f32.mrb[23].mxu1 }
 0x224   : > { %v2278_v2 = vpop.f32.mrb[20].mxu0 }
 0x225   : > { %v2279_v28 = vadd.f32 %v2278_v2, %v2205_v62  ;;  %v2280_v56 = vpop.f32.mrb[21].mxu0 }
 0x226   : > { %v2281_v40 = vadd.f32 %v2280_v56, %v2207_v22  ;;  %v2282_v4 = vpop.f32.mrb[22].mxu0 }
 0x227   : > { %v2601_v30 = vadd.f32 %v2600_v51, %v2279_v28  ;;  %v2283_v26 = vadd.f32 %v2282_v4, %v2209_v39  ;;  %v2284_v37 = vpop.f32.mrb[23].mxu0  ;;  %v3604_v51 = vmov 0.0  }
 0x228   : > { %v2614_v15 = vadd.f32 %v2613_v1, %v2281_v40  ;;  %v2285_v23 = vadd.f32 %v2284_v37, %v2211_v10  ;;  %v2215_v47 = vpop.f32.mrb[24].mxu1  ;;  %312 = vst.msk [vmem:[#allocation2] sm:$0x3f] %vm4853_vm0, %v3604_v51 }
 0x229   : > { %v2602_v52 = vadd.f32 %v2601_v30, %v2283_v26  ;;  %v2217_v6 = vpop.f32.mrb[25].mxu1 }
 0x22a   : > { %v2615_v7 = vadd.f32 %v2614_v15, %v2285_v23  ;;  %v2219_v20 = vpop.f32.mrb[26].mxu1 }
 0x22b   : > { %v2221_v16 = vpop.f32.mrb[27].mxu1 }
 0x22c   : > { %v2288_v48 = vpop.f32.mrb[24].mxu0 }
 0x22d   : > { %v2289_v55 = vadd.f32 %v2288_v48, %v2215_v47  ;;  %v2290_v38 = vpop.f32.mrb[25].mxu0 }
 0x22e   : > { %v2291_v8 = vadd.f32 %v2290_v38, %v2217_v6  ;;  %v2292_v41 = vpop.f32.mrb[26].mxu0 }
 0x22f   : > { %v2603_v14 = vadd.f32 %v2602_v52, %v2289_v55  ;;  %v2293_v50 = vadd.f32 %v2292_v41, %v2219_v20  ;;  %v2294_v19 = vpop.f32.mrb[27].mxu0 }
 0x230   : > { %v2616_v27 = vadd.f32 %v2615_v7, %v2291_v8  ;;  %v2295_v0 = vadd.f32 %v2294_v19, %v2221_v16  ;;  %v2225_v25 = vpop.f32.mrb[28].mxu1 }
 0x231   : > { %v2604_v59 = vadd.f32 %v2603_v14, %v2293_v50  ;;  %v2227_v57 = vpop.f32.mrb[29].mxu1 }
 0x232   : > { %v2617_v63 = vadd.f32 %v2616_v27, %v2295_v0  ;;  %v2229_v60 = vpop.f32.mrb[30].mxu1 }
 0x233   : > { %v2231_v24 = vpop.f32.mrb[31].mxu1 }
 0x234   : > { %v2298_v5 = vpop.f32.mrb[28].mxu0 }
 0x235   : > { %v2299_v31 = vadd.f32 %v2298_v5, %v2225_v25  ;;  %v2300_v42 = vpop.f32.mrb[29].mxu0 }
 0x236   : > { %v2301_v21 = vadd.f32 %v2300_v42, %v2227_v57  ;;  %v2302_v61 = vpop.f32.mrb[30].mxu0 }
 0x237   : > { %v2605_v13 = vadd.f32 %v2604_v59, %v2299_v31  ;;  %v2303_v3 = vadd.f32 %v2302_v61, %v2229_v60  ;;  %v2304_v36 = vpop.f32.mrb[31].mxu0 }
 0x238   : > { %v2618_v58 = vadd.f32 %v2617_v63, %v2301_v21  ;;  %v2305_v12 = vadd.f32 %v2304_v36, %v2231_v24 }
 0x239   : > { %v2606_v44 = vadd.f32 %v2605_v13, %v2303_v3 }
 0x23a   : > { %v2619_v34 = vadd.f32 %v2618_v58, %v2305_v12 }
 0x23b   : > { %v2607_v45 = vrot.slane %v2606_v44, 4 }
 0x23c   : > { %v2620_v53 = vrot.slane %v2619_v34, 4 }
 0x23d   : > { %v2608_v18 = vadd.f32 %v2607_v45, %v2606_v44 }
 0x23e   : > { %v2621_v43 = vadd.f32 %v2620_v53, %v2619_v34 }
 0x23f   : > { %v2609_v29 = vrot.slane %v2608_v18, 2 }
 0x240   : > { %v2622_v32 = vrot.slane %v2621_v43, 2 }
 0x241   : > { %v2610_v9 = vadd.f32 %v2609_v29, %v2608_v18 }
 0x242   : > { %v2623_v11 = vadd.f32 %v2622_v32, %v2621_v43 }
 0x243   : > { %v2611_v17 = vrot.slane %v2610_v9, 1 }
 0x244   : > { %v2624_v54 = vrot.slane %v2623_v11, 1 }
 0x245   : > { %v4848_v35 = vadd.f32 %v2611_v17, %v2610_v9 }
 0x246   : > { %v4850_v33 = vadd.f32 %v2624_v54, %v2623_v11 }
 0x248   : > { %v2684_v62 = vcombine.low %v4848_v35, %v4850_v33  ;;  %v2738_v35 = vld [vmem:[%s4910_s5] sm:$0x3f] }
 0x29a   : > { %v2414_v22 = vpop.f32.mrb[32].mxu1 }
 0x29b   : > { %v2416_v1 = vpop.f32.mrb[33].mxu1 }
 0x29c   : > { %v2560_v39 = vpop.f32.mrb[32].mxu0  ;;  %v2418_v10 = vpop.f32.mrb[34].mxu1 }
 0x29d   : > { %v2562_v2 = vpop.f32.mrb[33].mxu0  ;;  %v2626_v28 = vadd.f32 %v2418_v10, %v2414_v22  ;;  %v2420_v56 = vpop.f32.mrb[35].mxu1 }
 0x29e   : > { %v2564_v40 = vpop.f32.mrb[34].mxu0  ;;  %v2639_v4 = vadd.f32 %v2420_v56, %v2416_v1 }
 0x29f   : > { %v2652_v30 = vadd.f32 %v2564_v40, %v2560_v39  ;;  %v2566_v26 = vpop.f32.mrb[35].mxu0 }
 0x2a0   : > { %v2665_v37 = vadd.f32 %v2566_v26, %v2562_v2  ;;  %v3605_v2 = vmov 1966171168  }
 0x2a2   : > { %v2424_v15 = vpop.f32.mrb[36].mxu1 }
 0x2a3   : > { %v2627_v23 = vadd.f32 %v2626_v28, %v2424_v15  ;;  %v2426_v47 = vpop.f32.mrb[37].mxu1  ;;  %v2688_v28 = vunpack.c.l.s4 %v3605_v2 }
 0x2a4   : > { %v2570_v52 = vpop.f32.mrb[36].mxu0  ;;  %v2640_v6 = vadd.f32 %v2639_v4, %v2426_v47  ;;  %v2428_v7 = vpop.f32.mrb[38].mxu1 }
 0x2a5   : > { %v2653_v20 = vadd.f32 %v2652_v30, %v2570_v52  ;;  %v2572_v16 = vpop.f32.mrb[37].mxu0  ;;  %v2628_v48 = vadd.f32 %v2627_v23, %v2428_v7  ;;  %v2430_v55 = vpop.f32.mrb[39].mxu1  ;;  %v2689_v47 = vunpack.c.0.s8 %v2688_v28 }
 0x2a6   : > { %v2666_v38 = vadd.f32 %v2665_v37, %v2572_v16  ;;  %v2574_v8 = vpop.f32.mrb[38].mxu0  ;;  %v2641_v41 = vadd.f32 %v2640_v6, %v2430_v55 }
 0x2a7   : > { %v2654_v14 = vadd.f32 %v2653_v20, %v2574_v8  ;;  %v2576_v50 = vpop.f32.mrb[39].mxu0  ;;  %v4927_v8 = vld [vmem:[#allocation3_spill] sm:$0xff] }
 0x2a8   : > { %v2667_v19 = vadd.f32 %v2666_v38, %v2576_v50 }
 0x2aa   : > { %v2434_v27 = vpop.f32.mrb[40].mxu1 }
 0x2ab   : > { %v2629_v0 = vadd.f32 %v2628_v48, %v2434_v27  ;;  %v2436_v25 = vpop.f32.mrb[41].mxu1 }
 0x2ac   : > { %v2580_v59 = vpop.f32.mrb[40].mxu0  ;;  %v2642_v57 = vadd.f32 %v2641_v41, %v2436_v25  ;;  %v2438_v63 = vpop.f32.mrb[42].mxu1  ;;  %v2692_v41 = vsub.s32 %v2689_v47, %v4927_v8 }
 0x2ad   : > { %v2655_v60 = vadd.f32 %v2654_v14, %v2580_v59  ;;  %v2582_v24 = vpop.f32.mrb[41].mxu0  ;;  %v2630_v5 = vadd.f32 %v2629_v0, %v2438_v63  ;;  %v2440_v31 = vpop.f32.mrb[43].mxu1 }
 0x2ae   : > { %v2668_v42 = vadd.f32 %v2667_v19, %v2582_v24  ;;  %v2584_v21 = vpop.f32.mrb[42].mxu0  ;;  %v2643_v61 = vadd.f32 %v2642_v57, %v2440_v31  ;;  %v2693_v25 = vrot.slane %v2684_v62, %v2692_v41  ;;  %v2599_v31 = vld [vmem:[#allocation2] sm:$0x3f] }
 0x2af   : > { %v2656_v13 = vadd.f32 %v2655_v60, %v2584_v21  ;;  %v2586_v3 = vpop.f32.mrb[43].mxu0 }
 0x2b0   : > { %v2669_v36 = vadd.f32 %v2668_v42, %v2586_v3 }
 0x2b2   : > { %v2444_v58 = vpop.f32.mrb[44].mxu1 }
 0x2b3   : > { %v2631_v12 = vadd.f32 %v2630_v5, %v2444_v58  ;;  %v2446_v44 = vpop.f32.mrb[45].mxu1 }
 0x2b4   : > { %v2590_v34 = vpop.f32.mrb[44].mxu0  ;;  %v2644_v45 = vadd.f32 %v2643_v61, %v2446_v44  ;;  %v2448_v53 = vpop.f32.mrb[46].mxu1  ;;  %v4930_v44 = vsub.s32 2, %v4927_v8 }
 0x2b5   : > { %v2657_v18 = vadd.f32 %v2656_v13, %v2590_v34  ;;  %v2592_v43 = vpop.f32.mrb[45].mxu0  ;;  %v2632_v29 = vadd.f32 %v2631_v12, %v2448_v53  ;;  %v2450_v32 = vpop.f32.mrb[47].mxu1  ;;  %v2736_v13 = vld [vmem:[%s4909_s4] sm:$0x3f]  ;;  %v4929_v12 = vsub.s32 1, %v4927_v8  ;;  %v4931_v53 = vsub.s32 3, %v4927_v8 }
 0x2b6   : > { %v2670_v9 = vadd.f32 %v2669_v36, %v2592_v43  ;;  %v2594_v11 = vpop.f32.mrb[46].mxu0  ;;  %v2645_v17 = vadd.f32 %v2644_v45, %v2450_v32  ;;  %v4928_v36 = vsub.s32 0, %v4927_v8  ;;  %v2759_v45 = vsub.s32 4, %v4927_v8 }
 0x2b7   : > { %v2633_v54 = vrot.slane %v2632_v29, 4  ;;  %v2658_v46 = vadd.f32 %v2657_v18, %v2594_v11  ;;  %v2596_v51 = vpop.f32.mrb[47].mxu0  ;;  %v2763_v43 = vsub.s32 5, %v4927_v8 }
 0x2b8   : > { %v2646_v22 = vrot.slane %v2645_v17, 4  ;;  %v2671_v1 = vadd.f32 %v2670_v9, %v2596_v51 }
 0x2b9   : > { %v2634_v39 = vadd.f32 %v2633_v54, %v2632_v29  ;;  %v2659_v10 = vrot.slane %v2658_v46, 4 }
 0x2ba   : > { %v2647_v56 = vadd.f32 %v2646_v22, %v2645_v17  ;;  %v2672_v40 = vrot.slane %v2671_v1, 4 }
 0x2bb   : > { %v2635_v4 = vrot.slane %v2634_v39, 2  ;;  %v2660_v30 = vadd.f32 %v2659_v10, %v2658_v46 }
 0x2bc   : > { %v2648_v26 = vrot.slane %v2647_v56, 2  ;;  %v2673_v37 = vadd.f32 %v2672_v40, %v2671_v1 }
 0x2bd   : > { %v2636_v15 = vadd.f32 %v2635_v4, %v2634_v39  ;;  %v2661_v23 = vrot.slane %v2660_v30, 2 }
 0x2be   : > { %v2649_v52 = vadd.f32 %v2648_v26, %v2647_v56  ;;  %v2674_v6 = vrot.slane %v2673_v37, 2 }
 0x2bf   : > { %v2637_v7 = vrot.slane %v2636_v15, 1  ;;  %v2662_v20 = vadd.f32 %v2661_v23, %v2660_v30 }
 0x2c0   : > { %v2650_v16 = vrot.slane %v2649_v52, 1  ;;  %v2675_v48 = vadd.f32 %v2674_v6, %v2673_v37 }
 0x2c1   : > { %v2638_v55 = vadd.f32 %v2637_v7, %v2636_v15  ;;  %v2663_v38 = vrot.slane %v2662_v20, 1  ;;  %v2792_v15 = vld [vmem:[%s4911_s6] sm:$0x1] }
 0x2c2   : > { %v2651_v14 = vadd.f32 %v2650_v16, %v2649_v52  ;;  %v2676_v50 = vrot.slane %v2675_v48, 1 }
 0x2c3   : > { %v2664_v19 = vadd.f32 %v2663_v38, %v2662_v20 }
 0x2c4   : > { %v2685_v27 = vcombine.low %v2638_v55, %v2651_v14  ;;  %v2677_v0 = vadd.f32 %v2676_v50, %v2675_v48 }
 0x2c6   : > { %v2700_v59 = vrot.slane %v2685_v27, %v2692_v41  ;;  %v2686_v57 = vcombine.low %v2664_v19, %v2677_v0 }
 0x2c8   : > { %v2708_v63 = vcombine.low %v2693_v25, %v2700_v59  ;;  %v2707_v60 = vrot.slane %v2686_v57, %v2692_v41 }
 0x2ca   : > { %v2715_v24 = vrot.slane %v2708_v63, %v2692_v41  ;;  %v2722_v5 = vrot.slane %v2707_v60, %v2692_v41 }
 0x2cc   : > { %v2723_v42 = vcombine.low %v2715_v24, %v2722_v5 }
 0x2ce   : > { %v2725_v21 = vadd.f32 %v2723_v42, %v2599_v31 }
 0x2d0   : > { %2730 = vst.msk [vmem:[#allocation2] sm:$0x3f] %vm4853_vm0, %v2725_v21 }
 0x2d7   : > { %v2734_v61 = vld [vmem:[#allocation2] sm:$0x3f] }
 0x2d8   : > { %v2735_v3 = vmul.f32 0.015625, %v2734_v61 }
 0x2da   : > { %v2737_v33 = vadd.f32 %v2736_v13, %v2735_v3 }
 0x2dc   : > { %v2739_v62 = vmul.f32 %v2738_v35, %v2737_v33 }
 0x2de   : > { %v2744_v58 = vrot.slane %v2739_v62, %v4928_v36  ;;  %v2748_v49 = vrot.slane %v2739_v62, %v4929_v12  ;;  %v2752_v34 = vrot.slane %v2739_v62, %v4930_v44  ;;  %v2756_v18 = vrot.slane %v2739_v62, %v4931_v53 }
 0x2df   : > { %v2760_v11 = vrot.slane %v2739_v62, %v2759_v45  ;;  %v2764_v46 = vrot.slane %v2739_v62, %v2763_v43 }
 0x2e0   : > { %v2772_v29 = vsel %vm2771_vm1, %v2744_v58, 0.0  ;;  %v2773_v32 = vsel %vm2771_vm1, %v2748_v49, 0.0  ;;  %v2775_v17 = vsel %vm2771_vm1, %v2752_v34, 0.0  ;;  %v2777_v51 = vsel %vm2771_vm1, %v2756_v18, 0.0 }
 0x2e1   : > { %v2774_v9 = vadd.f32 %v2773_v32, %v2772_v29  ;;  %v2779_v1 = vsel %vm2771_vm1, %v2760_v11, 0.0  ;;  %v2781_v10 = vsel %vm2771_vm1, %v2764_v46, 0.0 }
 0x2e3   : > { %v2776_v54 = vadd.f32 %v2775_v17, %v2774_v9 }
 0x2e5   : > { %v2778_v22 = vadd.f32 %v2777_v51, %v2776_v54 }
 0x2e7   : > { %v2780_v39 = vadd.f32 %v2779_v1, %v2778_v22 }
 0x2e9   : > { %v2782_v2 = vadd.f32 %v2781_v10, %v2780_v39 }
 0x2eb   : > { %2783 = vadd.xlane.f32.xlu0 %v2782_v2 }
 0x378   : > { %v2784_v28 = vpop.xlane.xlu0 %2783 }
 0x379   : > { %v2785_v56 = vrot.slane %v2784_v28, 4 }
 0x37b   : > { %v2786_v40 = vadd.f32 %v2785_v56, %v2784_v28 }
 0x37d   : > { %v2787_v4 = vrot.slane %v2786_v40, 2 }
 0x37f   : > { %v2788_v30 = vadd.f32 %v2787_v4, %v2786_v40 }
 0x381   : > { %v2789_v26 = vrot.slane %v2788_v30, 1 }
 0x383   : > { %v2790_v37 = vadd.f32 %v2789_v26, %v2788_v30 }
 0x385   : > { %3144 = vpush %v2790_v37 }
 0x386   : > { %3146 = vpush %v2792_v15 }
 0x3b6   : > { %s3145_s12 = spop %3144 }
 0x3b7   : > { %s3147_s13 = spop %3146 }
 0x3b8   : > { %s2794_s17 = sadd.f32 %s3147_s13, %s3145_s12 }
 0x3ba   : > { %v2795_v23 = vstv %s2794_s17 }
 0x3bb   : > { %2796 = vst [vmem:[%s302_s16] sm:$0x1] %v2795_v23 }
 0x3bc PF: > { %s17_s26 = sadd.s32 1, %s3601_s26   ;;  %s4932_s24 = smov %s3597_s25 }
 0x3bd   : > { %p14_p5 = scmp.ge.s32.totalorder %s17_s26, 4   ;;  %s4933_s25 = smov %s4935_s27 }
 0x3bf   :  { %16 = sbr.rel (!%p14_p5) target bundleno = 2 (0x2), region = 86 }

</bundles_post_ra>
